<compile_context>
chip_gen: v6e
topology: v6e:2x2x1
jax: 0.10.0
libtpu: 0.0.40
codegen_flags: <defaults>
</compile_context>

<pallas_src>
import jax
import jax.numpy as jnp
from jax.experimental import pallas as pl
from jax.experimental.pallas import tpu as pltpu


# --------------------------------------------------------------------------- #
# Kernel
# --------------------------------------------------------------------------- #
def _rel_pos_kernel(q_ref, s_ref, gh_ref, gw_ref, gt_ref,
                    meh_ref, mew_ref, met_ref, o_ref):
    """scores + relative positional terms for one (row-block, K-tile).

    q_ref   : (TL, C)      bf16  query rows
    s_ref   : (TL, TK)     f32   attention scores (aliased with o_ref)
    g*_ref  : (Sg*C, TK)   bf16  per-coordinate column-expanded embedding slabs
    me*_ref : (TL, Sg*C)   bf16  per-coordinate lane-expanded one-hot masks (grid-invariant)
    o_ref   : (TL, TK)     f32   scores + rel_h + rel_w + rel_t
    """
    q = q_ref[...]                       # (TL, C) bf16
    c = q.shape[-1]

    def group_add(me_ref, g_ref):
        reps = me_ref.shape[-1] // c
        # Lane-tile q once for this group and apply the pre-expanded exact 0/1
        # mask with a single VPU multiply (replaces the old per-column
        # single-lane broadcasts + wide concat).
        q_tiled = jnp.concatenate([q] * reps, axis=-1)           # (TL, Sg*C) bf16
        qg = me_ref[...] * q_tiled                               # exact (mask is 0/1)
        return jnp.dot(qg, g_ref[...], preferred_element_type=jnp.float32)

    # Three per-coordinate matmuls accumulated in f32 (contraction depths
    # q_h*C / q_w*C / q_t*C) instead of one ragged (q_h+q_w+q_t)*C-deep one.
    o_ref[...] = (s_ref[...]
                  + group_add(meh_ref, gh_ref)
                  + group_add(mew_ref, gw_ref)
                  + group_add(met_ref, gt_ref))


# --------------------------------------------------------------------------- #
# Generation-aware VMEM / tiling heuristics
# --------------------------------------------------------------------------- #
def _tpu_vmem_capacity_bytes():
    try:
        info = pltpu.get_tpu_info()
        cap = int(getattr(info, "vmem_capacity_bytes"))
        if cap > 0:
            return cap
    except Exception:
        pass
    return 64 << 20            # conservative fallback (v7x-sized)


def _vmem_budget_bytes():
    cap = _tpu_vmem_capacity_bytes()
    # v5e/v6e: 128 MiB physical -> ~56 MiB working budget; v7x: 64 MiB -> 32 MiB.
    return int(min(cap // 2, 56 << 20))


def _vmem_limit_bytes(budget):
    cap = _tpu_vmem_capacity_bytes()
    return int(min(cap - (8 << 20), budget + (16 << 20)))


def _vmem_block_bytes(TL, TK, C, S):
    """Rough per-step VMEM footprint (double-buffered blocks + in-kernel temps)."""
    b = 2 * TL * C * 2                 # q block (dbl-buffered, bf16)
    b += 2 * 2 * TL * TK * 4           # scores in + out blocks (dbl-buffered, f32)
    b += 2 * S * C * TK * 2            # G slabs (worst-case dbl-buffered, bf16)
    b += 2 * TL * S * C * 2            # expanded masks (worst-case dbl-buffered, bf16)
    b += 2 * TL * S * C * 2            # tiled-q + masked-LHS staging (bf16)
    b += 3 * TL * TK * 4               # per-group f32 matmul results
    return b


def _choose_k_block(K_pad, L, C, S, budget_bytes, max_lanes=2048):
    """Largest multiple-of-128 divisor of K_pad that keeps a minimal row block in VMEM."""
    cands = [tk for tk in range(128, K_pad + 1, 128) if K_pad % tk == 0]
    if not cands:
        return K_pad
    ok = [tk for tk in cands
          if tk <= max_lanes and _vmem_block_bytes(max(L, 8), tk, C, S) <= budget_bytes]
    return max(ok) if ok else min(cands)


def _choose_row_block(bh, L, C, TK, S, budget_bytes):
    """How many (batch, head) pairs to process per grid step."""
    cands = [tb for tb in range(1, bh + 1) if bh % tb == 0]

    def aligned(tb):
        TL = tb * L
        return (TL % 16 == 0) or (tb == bh)      # bf16 sublane packing is 16 rows

    def fits(tb):
        return _vmem_block_bytes(tb * L, TK, C, S) <= budget_bytes

    valid = [tb for tb in cands if aligned(tb) and fits(tb)]
    if not valid:
        valid = [tb for tb in cands if aligned(tb)] or [bh]

    # Keep >= 2 row steps when possible (pipeline overlap / both v7x TCs get work);
    # prefer >= 4 steps if the block stays >= 256 rows; cap blocks near 1024 rows
    # (per-step overhead ~0.35 us, bigger blocks stop paying beyond that).
    pref = [tb for tb in valid if bh // tb >= 2] or valid
    deep = [tb for tb in pref if bh // tb >= 4 and tb * L >= 256]
    pool = deep or pref
    small = [tb for tb in pool if tb * L <= 1024] or [min(pool)]
    return max(small)


# --------------------------------------------------------------------------- #
# Module
# --------------------------------------------------------------------------- #
class RelativePositionalEmbedding2DPallas:
    """JAX/Pallas port of the PyTorch RelativePositionalEmbedding2D module."""

    def __init__(self, query_shape, memory_shape, query_dim, heads,
                 drop_rate=0.0, key=None, compute_dtype=jnp.bfloat16):
        q_t, q_h, q_w, _q_c = query_shape
        k_t, k_h, k_w, _k_c = memory_shape
        self.heads = heads
        self.query_seq_len, self.key_seq_len = q_t, k_t
        self.query_height, self.key_height = q_h, k_h
        self.query_width, self.key_width = q_w, k_w
        self.query_dim = query_dim
        self.drop_rate = drop_rate
        self.compute_dtype = compute_dtype
        # TODO(synk): training-mode dropout (drop_rate > 0) not implemented; p == 0 is identity.

        max_h = max(q_h, k_h) - 1
        max_w = max(q_w, k_w) - 1
        max_t = max(q_t, k_t) - 1

        if key is None:
            key = jax.random.PRNGKey(0)
        kh_, kw_, kt_ = jax.random.split(key, 3)
        self.height_embeddings = jax.random.normal(
            kh_, (2 * max_h + 1, query_dim), jnp.float32)
        self.width_embeddings = jax.random.normal(
            kw_, (2 * max_w + 1, query_dim), jnp.float32)
        self.time_embeddings = jax.random.normal(
            kt_, (2 * max_t + 1, query_dim), jnp.float32)

    # ---- glue: relative-distance index tables & embedding gathers ------------
    @staticmethod
    def _dist(q_n, k_n):
        q_ratio = round(max(k_n / q_n, 1.0))
        k_ratio = round(max(q_n / k_n, 1.0))
        d = (jnp.arange(q_n)[:, None] * q_ratio
             - jnp.arange(k_n)[None, :] * k_ratio
             + (k_n - 1) * k_ratio)
        return d.astype(jnp.int32)

    def _embedding_tables(self):
        Rh = self.height_embeddings[self._dist(self.query_height, self.key_height)]
        Rw = self.width_embeddings[self._dist(self.query_width, self.key_width)]
        Rt = self.time_embeddings[self._dist(self.query_seq_len, self.key_seq_len)]
        return Rh, Rw, Rt   # (q_h,k_h,C), (q_w,k_w,C), (Tq,Tk,C)

    # ---- forward --------------------------------------------------------------
    def __call__(self, query, scores):
        q_t, q_h, q_w = self.query_seq_len, self.query_height, self.query_width
        k_t, k_h, k_w = self.key_seq_len, self.key_height, self.key_width
        C = self.query_dim
        L = q_t * q_h * q_w
        K = k_t * k_h * k_w
        S = q_h + q_w + q_t
        cdt = self.compute_dtype

        Rh, Rw, Rt = self._embedding_tables()
        # Cast BEFORE the broadcasts so the expanded slabs materialize at bf16 size.
        Rh, Rw, Rt = (r.astype(cdt) for r in (Rh, Rw, Rt))

        # Lane-dense output: pad K up to a multiple of 128 (slice back afterwards).
        K_pad = ((K + 127) // 128) * 128

        def expand(R, axes):                       # (q_n, k_n, C) -> (q_n*C, K_pad)
            q_n = R.shape[0]
            G = jnp.transpose(R, (0, 2, 1))        # (q_n, C, k_n)
            G = jnp.expand_dims(G, axes)
            G = jnp.broadcast_to(G, (q_n, C, k_t, k_h, k_w)).reshape(q_n * C, K)
            if K_pad != K:
                G = jnp.pad(G, ((0, 0), (0, K_pad - K)))
            return G

        GH = expand(Rh, (2, 4))    # keeps k_h, broadcasts over (k_t, k_w)
        GW = expand(Rw, (2, 3))    # keeps k_w
        GT = expand(Rt, (3, 4))    # keeps k_t

        # One-hot coordinate masks over the query rows (l = (t*q_h + h)*q_w + w),
        # pre-expanded across the C lanes of q (grid-invariant kernel inputs).
        l = jnp.arange(L)
        MH = jax.nn.one_hot((l // q_w) % q_h, q_h, dtype=cdt)          # (L, q_h)
        MW = jax.nn.one_hot(l % q_w, q_w, dtype=cdt)                   # (L, q_w)
        MT = jax.nn.one_hot(l // (q_h * q_w), q_t, dtype=cdt)          # (L, q_t)

        B = query.shape[0]
        BH = B * self.heads

        budget = _vmem_budget_bytes()
        TK = _choose_k_block(K_pad, L, C, S, budget)
        TB = _choose_row_block(BH, L, C, TK, S, budget)
        TL = TB * L
        assert BH % TB == 0 and (TL % 16 == 0 or TB == BH), \
            f"degenerate row block: TB={TB}, TL={TL}"
        n_row = BH // TB
        n_col = K_pad // TK

        def expand_mask(M):
            ME = jnp.repeat(M, C, axis=1)          # (L, q_n*C): ME[l, s*C+c] = M[l, s]
            return jnp.tile(ME, (TB, 1))           # (TL, q_n*C) grid-invariant block

        MEH, MEW, MET = expand_mask(MH), expand_mask(MW), expand_mask(MT)

        q2 = query.reshape(BH * L, C).astype(cdt)                       # bf16 MXU operand
        s2 = scores.reshape(BH * L, K).astype(jnp.float32)
        if K_pad != K:
            s2 = jnp.pad(s2, ((0, 0), (0, K_pad - K)))

        flops = 2 * BH * L * S * C * K_pad
        bytes_acc = (BH * L * (C * 2 + K_pad * 8)          # q + scores read + out write
                     + S * C * K_pad * 2                   # embedding slabs
                     + TL * S * C * 2)                     # grid-invariant masks

        out = pl.pallas_call(
            _rel_pos_kernel,
            out_shape=jax.ShapeDtypeStruct((BH * L, K_pad), jnp.float32),
            grid=(n_row, n_col),
            in_specs=[
                pl.BlockSpec((TL, C), lambda i, j: (i, 0)),
                pl.BlockSpec((TL, TK), lambda i, j: (i, j)),
                pl.BlockSpec((q_h * C, TK), lambda i, j: (0, j)),
                pl.BlockSpec((q_w * C, TK), lambda i, j: (0, j)),
                pl.BlockSpec((q_t * C, TK), lambda i, j: (0, j)),
                pl.BlockSpec((TL, q_h * C), lambda i, j: (0, 0)),      # grid-invariant
                pl.BlockSpec((TL, q_w * C), lambda i, j: (0, 0)),      # grid-invariant
                pl.BlockSpec((TL, q_t * C), lambda i, j: (0, 0)),      # grid-invariant
            ],
            out_specs=pl.BlockSpec((TL, TK), lambda i, j: (i, j)),
            input_output_aliases={1: 0},                   # accumulate into scores
            compiler_params=pltpu.CompilerParams(
                dimension_semantics=("parallel", "parallel"),
                vmem_limit_bytes=_vmem_limit_bytes(budget)),
            cost_estimate=pl.CostEstimate(
                flops=int(flops), transcendentals=0, bytes_accessed=int(bytes_acc)),
        )(q2, s2, GH, GW, GT, MEH, MEW, MET)

        if K_pad != K:
            out = out[:, :K]
        return out.reshape(B, self.heads, L, K)

    # ---- pure-JAX reference (mirrors the PyTorch forward) ---------------------
    def reference(self, query, scores, compute_dtype=jnp.float32):
        q_t, q_h, q_w = self.query_seq_len, self.query_height, self.query_width
        k_t, k_h, k_w = self.key_seq_len, self.key_height, self.key_width
        C = self.query_dim
        Rh, Rw, Rt = self._embedding_tables()
        Rh, Rw, Rt = (x.astype(compute_dtype) for x in (Rh, Rw, Rt))
        B = query.shape[0]
        q6 = query.reshape(B, self.heads, q_t, q_h, q_w, C).astype(compute_dtype)
        rel_h = jnp.einsum('bNthwc,hkc->bNthwk', q6, Rh,
                           preferred_element_type=jnp.float32)
        rel_w = jnp.einsum('bNthwc,wkc->bNthwk', q6, Rw,
                           preferred_element_type=jnp.float32)
        rel_t = jnp.einsum('bNthwc,tkc->bNthwk', q6, Rt,
                           preferred_element_type=jnp.float32)
        s8 = scores.reshape(B, self.heads, q_t, q_h, q_w, k_t, k_h, k_w).astype(jnp.float32)
        s8 = s8 + rel_h[:, :, :, :, :, None, :, None]
        s8 = s8 + rel_w[:, :, :, :, :, None, None, :]
        s8 = s8 + rel_t[:, :, :, :, :, :, None, None]
        return s8.reshape(B, self.heads, q_t * q_h * q_w, k_t * k_h * k_w)


if __name__ == "__main__":
    B, heads = 2, 2
    Tq = Tk = 2
    q_h = q_w = k_h = k_w = 8
    C = 32                     # query_dim (per-head)
    L = Tq * q_h * q_w         # 128
    K = Tk * k_h * k_w         # 128

    module = RelativePositionalEmbedding2DPallas(
        query_shape=(Tq, q_h, q_w, heads * C),
        memory_shape=(Tk, k_h, k_w, heads * C),
        query_dim=C, heads=heads, drop_rate=0.0,
        key=jax.random.PRNGKey(0))

    k1, k2 = jax.random.split(jax.random.PRNGKey(0), 2)
    query = jax.random.normal(k1, (B, heads, L, C), jnp.float32)
    scores = jax.random.normal(k2, (B, heads, L, K), jnp.float32)

    # References first: scores is donated to the kernel call below so that the
    # in-place alias (input_output_aliases={1: 0}) avoids a defensive copy.
    ref_bf16 = module.reference(query, scores, compute_dtype=jnp.bfloat16)
    ref_f32 = module.reference(query, scores, compute_dtype=jnp.float32)

    fwd = jax.jit(module.__call__, donate_argnums=(1,))
    out = jax.block_until_ready(fwd(query, scores))

    assert out.shape == ref_f32.shape == (B, heads, L, K)
    err_bf16 = float(jnp.max(jnp.abs(out - ref_bf16)))   # same bf16 operands, f32 accum
    err_f32 = float(jnp.max(jnp.abs(out - ref_f32)))     # vs full-f32 math (bf16 rounding)
    assert err_bf16 < 1e-2, f"bf16-consistent max abs err {err_bf16}"
    assert err_f32 < 1.0, f"f32-reference max abs err {err_f32}"

    print("KERNEL_OK")
</pallas_src>

<mosaic_0001>
module attributes {stable_mosaic.version = 11 : i64} {
  func.func @_rel_pos_kernel(%arg0: i32, %arg1: i32, %arg2: memref<256x32xbf16, #tpu.memory_space<vmem>>, %arg3: memref<256x128xf32, #tpu.memory_space<vmem>>, %arg4: memref<256x128xbf16, #tpu.memory_space<vmem>>, %arg5: memref<256x128xbf16, #tpu.memory_space<vmem>>, %arg6: memref<64x128xbf16, #tpu.memory_space<vmem>>, %arg7: memref<256x256xbf16, #tpu.memory_space<vmem>>, %arg8: memref<256x256xbf16, #tpu.memory_space<vmem>>, %arg9: memref<256x64xbf16, #tpu.memory_space<vmem>>, %arg10: memref<256x128xf32, #tpu.memory_space<vmem>>) attributes {dimension_semantics = [#tpu.dimension_semantics<parallel>, #tpu.dimension_semantics<parallel>], iteration_bounds = array<i64: 2, 1>, scalar_prefetch = 0 : i64, scratch_operands = 0 : i64, tpu.core_type = #tpu.core_type<tc>, window_params = [{transform_indices = @transform_0, window_bounds = array<i64: 256, 32>}, {transform_indices = @transform_1, window_bounds = array<i64: 256, 128>}, {transform_indices = @transform_2, window_bounds = array<i64: 256, 128>}, {transform_indices = @transform_3, window_bounds = array<i64: 256, 128>}, {transform_indices = @transform_4, window_bounds = array<i64: 64, 128>}, {pipeline_mode = #tpu.pipeline_mode<synchronous>, transform_indices = @transform_5, window_bounds = array<i64: 256, 256>}, {pipeline_mode = #tpu.pipeline_mode<synchronous>, transform_indices = @transform_6, window_bounds = array<i64: 256, 256>}, {pipeline_mode = #tpu.pipeline_mode<synchronous>, transform_indices = @transform_7, window_bounds = array<i64: 256, 64>}, {transform_indices = @transform_8, window_bounds = array<i64: 256, 128>}]} {
    %c0 = arith.constant 0 : index
    %c0_0 = arith.constant 0 : index
    %0 = vector.load %arg2[%c0, %c0_0] : memref<256x32xbf16, #tpu.memory_space<vmem>>, vector<256x32xbf16>
    %c0_1 = arith.constant 0 : index
    %c0_2 = arith.constant 0 : index
    %1 = vector.load %arg3[%c0_1, %c0_2] : memref<256x128xf32, #tpu.memory_space<vmem>>, vector<256x128xf32>
    %2 = tpu.concatenate %0, %0, %0, %0, %0, %0, %0, %0 in 1 : vector<256x32xbf16>, vector<256x32xbf16>, vector<256x32xbf16>, vector<256x32xbf16>, vector<256x32xbf16>, vector<256x32xbf16>, vector<256x32xbf16>, vector<256x32xbf16> -> vector<256x256xbf16>
    %c0_3 = arith.constant 0 : index
    %c0_4 = arith.constant 0 : index
    %3 = vector.load %arg7[%c0_3, %c0_4] : memref<256x256xbf16, #tpu.memory_space<vmem>>, vector<256x256xbf16>
    %4 = arith.mulf %3, %2 : vector<256x256xbf16>
    %c0_5 = arith.constant 0 : index
    %c0_6 = arith.constant 0 : index
    %5 = vector.load %arg4[%c0_5, %c0_6] : memref<256x128xbf16, #tpu.memory_space<vmem>>, vector<256x128xbf16>
    %cst = arith.constant dense<0.000000e+00> : vector<256x128xf32>
    %6 = tpu.matmul %4, %5, %cst {dimension_numbers = #tpu.dot_dimension_numbers<[1], [0], [0], [1], [0, 0, 1, 1], [], []>} : vector<256x256xbf16>, vector<256x128xbf16>, vector<256x128xf32> -> vector<256x128xf32>
    %7 = arith.addf %1, %6 : vector<256x128xf32>
    %8 = tpu.concatenate %0, %0, %0, %0, %0, %0, %0, %0 in 1 : vector<256x32xbf16>, vector<256x32xbf16>, vector<256x32xbf16>, vector<256x32xbf16>, vector<256x32xbf16>, vector<256x32xbf16>, vector<256x32xbf16>, vector<256x32xbf16> -> vector<256x256xbf16>
    %c0_7 = arith.constant 0 : index
    %c0_8 = arith.constant 0 : index
    %9 = vector.load %arg8[%c0_7, %c0_8] : memref<256x256xbf16, #tpu.memory_space<vmem>>, vector<256x256xbf16>
    %10 = arith.mulf %9, %8 : vector<256x256xbf16>
    %c0_9 = arith.constant 0 : index
    %c0_10 = arith.constant 0 : index
    %11 = vector.load %arg5[%c0_9, %c0_10] : memref<256x128xbf16, #tpu.memory_space<vmem>>, vector<256x128xbf16>
    %cst_11 = arith.constant dense<0.000000e+00> : vector<256x128xf32>
    %12 = tpu.matmul %10, %11, %cst_11 {dimension_numbers = #tpu.dot_dimension_numbers<[1], [0], [0], [1], [0, 0, 1, 1], [], []>} : vector<256x256xbf16>, vector<256x128xbf16>, vector<256x128xf32> -> vector<256x128xf32>
    %13 = arith.addf %7, %12 : vector<256x128xf32>
    %14 = tpu.concatenate %0, %0 in 1 : vector<256x32xbf16>, vector<256x32xbf16> -> vector<256x64xbf16>
    %c0_12 = arith.constant 0 : index
    %c0_13 = arith.constant 0 : index
    %15 = vector.load %arg9[%c0_12, %c0_13] : memref<256x64xbf16, #tpu.memory_space<vmem>>, vector<256x64xbf16>
    %16 = arith.mulf %15, %14 : vector<256x64xbf16>
    %c0_14 = arith.constant 0 : index
    %c0_15 = arith.constant 0 : index
    %17 = vector.load %arg6[%c0_14, %c0_15] : memref<64x128xbf16, #tpu.memory_space<vmem>>, vector<64x128xbf16>
    %cst_16 = arith.constant dense<0.000000e+00> : vector<256x128xf32>
    %18 = tpu.matmul %16, %17, %cst_16 {dimension_numbers = #tpu.dot_dimension_numbers<[1], [0], [0], [1], [0, 0, 1, 1], [], []>} : vector<256x64xbf16>, vector<64x128xbf16>, vector<256x128xf32> -> vector<256x128xf32>
    %19 = arith.addf %13, %18 : vector<256x128xf32>
    %c0_17 = arith.constant 0 : index
    %c0_18 = arith.constant 0 : index
    %20 = vector.load %arg10[%c0_17, %c0_18] : memref<256x128xf32, #tpu.memory_space<vmem>>, vector<256x128xf32>
    tpu.vector_store %arg10[%c0_17, %c0_18], %19 {strides = array<i32>} : memref<256x128xf32, #tpu.memory_space<vmem>>, vector<256x128xf32>,
    return
  }
  func.func @transform_0(%arg0: i32, %arg1: i32) -> (i32, i32) {
    %c0_i32 = arith.constant 0 : i32
    %c0_i32_0 = arith.constant 0 : i32
    return %arg0, %c0_i32 : i32, i32
  }
  func.func @transform_1(%arg0: i32, %arg1: i32) -> (i32, i32) {
    %c0_i32 = arith.constant 0 : i32
    return %arg0, %arg1 : i32, i32
  }
  func.func @transform_2(%arg0: i32, %arg1: i32) -> (i32, i32) {
    %c0_i32 = arith.constant 0 : i32
    %c0_i32_0 = arith.constant 0 : i32
    return %c0_i32, %arg1 : i32, i32
  }
  func.func @transform_3(%arg0: i32, %arg1: i32) -> (i32, i32) {
    %c0_i32 = arith.constant 0 : i32
    %c0_i32_0 = arith.constant 0 : i32
    return %c0_i32, %arg1 : i32, i32
  }
  func.func @transform_4(%arg0: i32, %arg1: i32) -> (i32, i32) {
    %c0_i32 = arith.constant 0 : i32
    %c0_i32_0 = arith.constant 0 : i32
    return %c0_i32, %arg1 : i32, i32
  }
  func.func @transform_5(%arg0: i32, %arg1: i32) -> (i32, i32) {
    %c0_i32 = arith.constant 0 : i32
    %c0_i32_0 = arith.constant 0 : i32
    %c0_i32_1 = arith.constant 0 : i32
    return %c0_i32, %c0_i32_0 : i32, i32
  }
  func.func @transform_6(%arg0: i32, %arg1: i32) -> (i32, i32) {
    %c0_i32 = arith.constant 0 : i32
    %c0_i32_0 = arith.constant 0 : i32
    %c0_i32_1 = arith.constant 0 : i32
    return %c0_i32, %c0_i32_0 : i32, i32
  }
  func.func @transform_7(%arg0: i32, %arg1: i32) -> (i32, i32) {
    %c0_i32 = arith.constant 0 : i32
    %c0_i32_0 = arith.constant 0 : i32
    %c0_i32_1 = arith.constant 0 : i32
    return %c0_i32, %c0_i32_0 : i32, i32
  }
  func.func @transform_8(%arg0: i32, %arg1: i32) -> (i32, i32) {
    %c0_i32 = arith.constant 0 : i32
    return %arg0, %arg1 : i32, i32
  }
}

</mosaic_0001>

<bundles_post_ra>
// kernel: a_call__.1
= control target key start
LH: loop header
LB: loop body
LE: loop exit
PB: predicated region body
PF: predicated region fallthrough
CT: control target
= control target key end

     0   :  { %s3346_s27 = smov 0   ;;  %s3348_s28 = smov 0   ;;  %s4633_s0 = inlined_call_operand.vmem [shape: bf16[512,32], index: 0, kind: input, shape index: {}]   ;;  %s4634_s1 = inlined_call_operand.vmem [shape: f32[512,128], index: 1, kind: input, shape index: {}, may-alias: {1,8}]   ;;  %s4635_s2 = inlined_call_operand.vmem [shape: bf16[256,128], index: 2, kind: input, shape index: {}]   ;;  %s4636_s3 = inlined_call_operand.vmem [shape: bf16[256,128], index: 3, kind: input, shape index: {}]   ;;  %s4637_s4 = inlined_call_operand.vmem [shape: bf16[64,128], index: 4, kind: input, shape index: {}]   ;;  %s4638_s5 = inlined_call_operand.vmem [shape: bf16[256,256], index: 5, kind: input, shape index: {}]   ;;  %s4639_s6 = inlined_call_operand.vmem [shape: bf16[256,256], index: 6, kind: input, shape index: {}]   ;;  %s4640_s7 = inlined_call_operand.vmem [shape: bf16[256,64], index: 7, kind: input, shape index: {}]   ;;  %s4641_s8 = inlined_call_operand.vmem [shape: f32[512,128], index: 8, kind: output, shape index: {}, may-alias: {1,8}]  }
   0x1   :  { %s3350_s29 = smov 0  }
   0x2 LB: > { %s30_s30 = sadd.s32 1, %s3292_s28  ;;  %p2674_p0 = scmp.ge.s32.totalorder %s3296_s29, 1  ;;  %s3296_s29 = sphi %s3350_s29, %s18_s29   ;;  %s3292_s28 = sphi %s3348_s28, %s4697_s28   ;;  %s3288_s27 = sphi %s3346_s27, %s4696_s27  }
   0x3   : > { %p32_p1 = scmp.ge.s32.totalorder %s30_s30, 2  ;;  %p320_p2 = scmp.lt.s32.totalorder %s3296_s29, 3 }
   0x5   : > { %s4699_s30 = smov (%p32_p1, %s30_s30), 0  ;;  %p321_p3 = pnand %p2674_p0, %p320_p2 }
   0x7   : > { %324 = sbr.rel (%p321_p3) target bundleno = 517 (0x205), region = 52 }
   0xc   : > { %s2675_s9 = sshll.u32 %s3288_s27, 5  ;;  %v3237_v0 = vld [vmem:[%s4635_s2 + $0x78] sm:$0xff]   ;;  %v3239_v2 = vld [vmem:[%s4635_s2 + $0x70] sm:$0xff]   ;;  %v3242_v4 = vld [vmem:[%s4635_s2 + $0x68] sm:$0xff]   ;;  %s3298_s26 = smov 32   ;;  %vm654_vm0 = vcmask 261120  }
   0xd   : > { %p378_p4 = scmp.lt.s32.totalorder %s2675_s9, 63  ;;  %v3238_v1 = vld [vmem:[%s4635_s2 + $0x38] sm:$0xff]   ;;  %3179 = vmatprep.subr.bf16.mxu1 %v3237_v0  ;;  %2895 = vmatprep.subr.bf16.mxu0 %v3237_v0  ;;  %v3240_v3 = vld [vmem:[%s4635_s2 + $0x30] sm:$0xff]   ;;  %v3243_v5 = vld [vmem:[%s4635_s2 + $0x28] sm:$0xff]   ;;  %s3299_s27 = smov 96   ;;  %vm703_vm1 = vcmask 523264  }
   0xe   : > { %3187 = vmatpush3.bf16.msra.mxu1 %v3238_v1  ;;  %2896 = vmatpush3.bf16.msra.mxu0 %v3238_v1  ;;  %s3300_s10 = smov 64   ;;  %v3244_v10 = vld [vmem:[%s4635_s2 + $0x60] sm:$0xff]   ;;  %v3246_v12 = vld [vmem:[%s4635_s2 + $0x58] sm:$0xff]   ;;  %v3248_v15 = vld [vmem:[%s4635_s2 + $0x50] sm:$0xff]   ;;  %vm736_vm2 = vcmask 785408  }
   0xf   : > { %s4701_s9 = smov (!%p378_p4, %s2675_s9), 63  ;;  %3180 = vmatprep.subr.bf16.mxu1 %v3239_v2  ;;  %2897 = vmatprep.subr.bf16.mxu0 %v3239_v2  ;;  %v3245_v11 = vld [vmem:[%s4635_s2 + $0x20] sm:$0xff]   ;;  %v3247_v13 = vld [vmem:[%s4635_s2 + $0x18] sm:$0xff]   ;;  %v3249_v16 = vld [vmem:[%s4635_s2 + $0x10] sm:$0xff]  }
  0x10   : > { %s2676_s18 = sshll.u32 %s4701_s9, 2  ;;  %v3250_v17 = vld [vmem:[%s4635_s2 + $0x48] sm:$0xff]   ;;  %v3252_v20 = vld [vmem:[%s4635_s2 + $0x40] sm:$0xff]   ;;  %v3254_v23 = vld [vmem:[%s4636_s3 + $0x78] sm:$0xff]   ;;  %s2678_s15 = sshll.u32 %s4701_s9, 3 }
  0x11   : > { %s3385_s23 = scalar_lea.vmem %s4633_s0, %s2676_s18  ;;  %v3251_v19 = vld [vmem:[%s4635_s2 + $0x8] sm:$0xff]   ;;  %v3253_v21 = vld [vmem:[%s4635_s2] sm:$0xff]   ;;  %v3490_v25 = vld [vmem:[%s4637_s4 + $0x18] sm:$0xff]   ;;  %s4266_s18 = scalar_lea.vmem %s4634_s1, %s2678_s15 }
  0x12   : > { %v3391_v6 = vld [vmem:[%s3385_s23 + $0x60] sm:$0xff]   ;;  %3188 = vmatpush3.bf16.msra.mxu1 %v3240_v3  ;;  %2898 = vmatpush3.bf16.msra.mxu0 %v3240_v3  ;;  %v3409_v8 = vld [vmem:[%s3385_s23 + $0x68] sm:$0xff]   ;;  %v3435_v14 = vld [vmem:[%s3385_s23 + $0x70] sm:$0xff]  }
  0x13   : > { %v3394_v7 = vld [vmem:[%s3385_s23] sm:$0xff]   ;;  %582 = vrot.lane.b32.xlu0 %v3391_v6, %s3298_s26  ;;  %646 = vrot.lane.b32.xlu1 %v3391_v6, %s3299_s27  ;;  %v3412_v9 = vld [vmem:[%s3385_s23 + $0x8] sm:$0xff]  }
  0x14   : > { %3181 = vmatprep.subr.bf16.mxu1 %v3242_v4  ;;  %2899 = vmatprep.subr.bf16.mxu0 %v3242_v4  ;;  %v3455_v18 = vld [vmem:[%s3385_s23 + $0x10] sm:$0xff]   ;;  %v3475_v22 = vld [vmem:[%s3385_s23 + $0x78] sm:$0xff]   ;;  %v3502_v26 = vld [vmem:[%s3385_s23 + $0x20] sm:$0xff]  }
  0x15   : > { %v3485_v24 = vld [vmem:[%s3385_s23 + $0x18] sm:$0xff]   ;;  %v3509_v27 = vld [vmem:[%s3385_s23 + $0x28] sm:$0xff]   ;;  %v3520_v28 = vld [vmem:[%s3385_s23 + $0x30] sm:$0xff]  }
  0x16   : > { %3189 = vmatpush3.bf16.msra.mxu1 %v3243_v5  ;;  %2900 = vmatpush3.bf16.msra.mxu0 %v3243_v5  ;;  %v3527_v29 = vld [vmem:[%s3385_s23 + $0x38] sm:$0xff]   ;;  %v3538_v30 = vld [vmem:[%s3385_s23 + $0x40] sm:$0xff]   ;;  %v3545_v31 = vld [vmem:[%s3385_s23 + $0x48] sm:$0xff]  }
  0x17   : > { %614 = vrot.lane.b32.xlu0 %v3391_v6, %s3300_s10  ;;  %558 = vrot.lane.b32.xlu1 %v3394_v7, %s3298_s26  ;;  %v3556_v32 = vld [vmem:[%s3385_s23 + $0x50] sm:$0xff]   ;;  %v3563_v33 = vld [vmem:[%s3385_s23 + $0x58] sm:$0xff]   ;;  %s4452_s23 = scalar_lea.vmem %s4641_s8, %s2678_s15 }
  0x18   : > { %3182 = vmatprep.subr.bf16.mxu1 %v3244_v10  ;;  %2901 = vmatprep.subr.bf16.mxu0 %v3244_v10  ;;  %v793_v41 = vld [vmem:[%s4638_s5 + $0xc0] sm:$0xff]  ;;  %v794_v42 = vld [vmem:[%s4638_s5 + $0xc8] sm:$0xff]  ;;  %v3255_v62 = vld [vmem:[%s4636_s3 + $0x38] sm:$0xff]  }
  0x19   : > { %v1450_v43 = vld [vmem:[%s4639_s6 + $0xc0] sm:$0xff]  ;;  %v1451_v46 = vld [vmem:[%s4639_s6 + $0xc8] sm:$0xff]  ;;  %v3256_v1 = vld [vmem:[%s4636_s3 + $0x70] sm:$0xff]  }
  0x1a   : > { %3190 = vmatpush3.bf16.msra.mxu1 %v3245_v11  ;;  %2902 = vmatpush3.bf16.msra.mxu0 %v3245_v11  ;;  %v769_v55 = vld [vmem:[%s4638_s5] sm:$0xff]  ;;  %v770_v61 = vld [vmem:[%s4638_s5 + $0x8] sm:$0xff]  ;;  %v795_v11 = vld [vmem:[%s4638_s5 + $0xd0] sm:$0xff] }
  0x1b   : > { %590 = vrot.lane.b32.xlu0 %v3394_v7, %s3300_s10  ;;  %622 = vrot.lane.b32.xlu1 %v3394_v7, %s3299_s27 }
  0x1c   : > { %3183 = vmatprep.subr.bf16.mxu1 %v3246_v12  ;;  %2903 = vmatprep.subr.bf16.mxu0 %v3246_v12  ;;  %v1452_v12 = vld [vmem:[%s4639_s6 + $0xd0] sm:$0xff] }
  0x1e   : > { %3191 = vmatpush3.bf16.msra.mxu1 %v3247_v13  ;;  %2904 = vmatpush3.bf16.msra.mxu0 %v3247_v13 }
  0x1f   : > { %584 = vrot.lane.b32.xlu0 %v3409_v8, %s3298_s26  ;;  %616 = vrot.lane.b32.xlu1 %v3409_v8, %s3300_s10 }
  0x20   : > { %3184 = vmatprep.subr.bf16.mxu1 %v3248_v15  ;;  %2905 = vmatprep.subr.bf16.mxu0 %v3248_v15 }
  0x22   : > { %3192 = vmatpush3.bf16.msra.mxu1 %v3249_v16  ;;  %2906 = vmatpush3.bf16.msra.mxu0 %v3249_v16 }
  0x23   : > { %648 = vrot.lane.b32.xlu0 %v3409_v8, %s3299_s27  ;;  %560 = vrot.lane.b32.xlu1 %v3412_v9, %s3298_s26 }
  0x24   : > { %3185 = vmatprep.subr.bf16.mxu1 %v3250_v17  ;;  %2907 = vmatprep.subr.bf16.mxu0 %v3250_v17 }
  0x26   : > { %3193 = vmatpush3.bf16.msra.mxu1 %v3251_v19  ;;  %2908 = vmatpush3.bf16.msra.mxu0 %v3251_v19  ;;  %v1453_v19 = vld [vmem:[%s4639_s6 + $0xd8] sm:$0xff] }
  0x27   : > { %592 = vrot.lane.b32.xlu0 %v3412_v9, %s3300_s10  ;;  %624 = vrot.lane.b32.xlu1 %v3412_v9, %s3299_s27 }
  0x28   : > { %3186 = vmatprep.subr.bf16.mxu1 %v3252_v20  ;;  %2909 = vmatprep.subr.bf16.mxu0 %v3252_v20 }
  0x2a   : > { %3194 = vmatpush3.bf16.msra.mxu1 %v3253_v21  ;;  %2910 = vmatpush3.bf16.msra.mxu0 %v3253_v21  ;;  %v3259_v21 = vld [vmem:[%s4636_s3 + $0x68] sm:$0xff]  }
  0x2b   : > { %586 = vrot.lane.b32.xlu0 %v3435_v14, %s3298_s26  ;;  %618 = vrot.lane.b32.xlu1 %v3435_v14, %s3300_s10 }
  0x2c   : > { %3007 = vmatprep.subr.bf16.mxu1 %v3254_v23  ;;  %3139 = vmatprep.subr.bf16.mxu0 %v3490_v25  ;;  %v3270_v23 = vld [vmem:[%s4637_s4 + $0x10] sm:$0xff]  }
  0x2f   : > { %650 = vrot.lane.b32.xlu0 %v3435_v14, %s3299_s27  ;;  %562 = vrot.lane.b32.xlu1 %v3455_v18, %s3298_s26 }
  0x33   : > { %594 = vrot.lane.b32.xlu0 %v3455_v18, %s3300_s10  ;;  %626 = vrot.lane.b32.xlu1 %v3455_v18, %s3299_s27 }
  0x37   : > { %588 = vrot.lane.b32.xlu0 %v3475_v22, %s3298_s26  ;;  %620 = vrot.lane.b32.xlu1 %v3475_v22, %s3300_s10 }
  0x3b   : > { %652 = vrot.lane.b32.xlu0 %v3475_v22, %s3299_s27  ;;  %564 = vrot.lane.b32.xlu1 %v3485_v24, %s3298_s26 }
  0x3f   : > { %596 = vrot.lane.b32.xlu0 %v3485_v24, %s3300_s10  ;;  %628 = vrot.lane.b32.xlu1 %v3485_v24, %s3299_s27 }
  0x43   : > { %566 = vrot.lane.b32.xlu0 %v3502_v26, %s3298_s26  ;;  %598 = vrot.lane.b32.xlu1 %v3502_v26, %s3300_s10 }
  0x47   : > { %630 = vrot.lane.b32.xlu0 %v3502_v26, %s3299_s27  ;;  %568 = vrot.lane.b32.xlu1 %v3509_v27, %s3298_s26 }
  0x4b   : > { %600 = vrot.lane.b32.xlu0 %v3509_v27, %s3300_s10  ;;  %632 = vrot.lane.b32.xlu1 %v3509_v27, %s3299_s27 }
  0x4f   : > { %570 = vrot.lane.b32.xlu0 %v3520_v28, %s3298_s26  ;;  %602 = vrot.lane.b32.xlu1 %v3520_v28, %s3300_s10 }
  0x53   : > { %634 = vrot.lane.b32.xlu0 %v3520_v28, %s3299_s27  ;;  %572 = vrot.lane.b32.xlu1 %v3527_v29, %s3298_s26 }
  0x57   : > { %604 = vrot.lane.b32.xlu0 %v3527_v29, %s3300_s10  ;;  %636 = vrot.lane.b32.xlu1 %v3527_v29, %s3299_s27 }
  0x5b   : > { %574 = vrot.lane.b32.xlu0 %v3538_v30, %s3298_s26  ;;  %606 = vrot.lane.b32.xlu1 %v3538_v30, %s3300_s10 }
  0x5f   : > { %638 = vrot.lane.b32.xlu0 %v3538_v30, %s3299_s27  ;;  %576 = vrot.lane.b32.xlu1 %v3545_v31, %s3298_s26 }
  0x63   : > { %608 = vrot.lane.b32.xlu0 %v3545_v31, %s3300_s10  ;;  %640 = vrot.lane.b32.xlu1 %v3545_v31, %s3299_s27 }
  0x67   : > { %578 = vrot.lane.b32.xlu0 %v3556_v32, %s3298_s26  ;;  %610 = vrot.lane.b32.xlu1 %v3556_v32, %s3300_s10 }
  0x6b   : > { %642 = vrot.lane.b32.xlu0 %v3556_v32, %s3299_s27  ;;  %580 = vrot.lane.b32.xlu1 %v3563_v33, %s3298_s26 }
  0x6f   : > { %612 = vrot.lane.b32.xlu0 %v3563_v33, %s3300_s10  ;;  %644 = vrot.lane.b32.xlu1 %v3563_v33, %s3299_s27 }
  0x85   : > { %v583_v34 = vpop.permute.xlu0 %582  ;;  %v647_v35 = vpop.permute.xlu1 %646 }
  0x86   : > { %v3575_v36 = vsel %vm654_vm0, %v3391_v6, %v583_v34 }
  0x89   : > { %v615_v37 = vpop.permute.xlu0 %614  ;;  %v559_v38 = vpop.permute.xlu1 %558 }
  0x8a   : > { %v729_v39 = vsel %vm703_vm1, %v3575_v36, %v615_v37  ;;  %v3594_v47 = vsel %vm654_vm0, %v3394_v7, %v559_v38  ;;  %v3258_v7 = vld [vmem:[%s4636_s3 + $0x30] sm:$0xff]   ;;  %v3260_v38 = vld [vmem:[%s4636_s3 + $0x28] sm:$0xff]  }
  0x8b   : > { %v762_v40 = vsel %vm736_vm2, %v729_v39, %v647_v35 }
  0x8c   : > { %v2721_v44 = vcombine.low %v762_v40, %v762_v40  ;;  %v2722_v45 = vcombine.high %v762_v40, %v762_v40 }
  0x8d   : > { %v591_v48 = vpop.permute.xlu0 %590  ;;  %v623_v49 = vpop.permute.xlu1 %622 }
  0x8e   : > { %v705_v50 = vsel %vm703_vm1, %v3594_v47, %v591_v48  ;;  %v937_v51 = vmul.bf16 %v2721_v44, %v793_v41  ;;  %v938_v52 = vmul.bf16 %v2722_v45, %v794_v42  ;;  %v3598_v53 = vmul.bf16 %v2721_v44, %v1450_v43  ;;  %v772_v48 = vld [vmem:[%s4638_s5 + $0x18] sm:$0xff] }
  0x8f   : > { %v738_v54 = vsel %vm736_vm2, %v705_v50, %v623_v49  ;;  %v3604_v56 = vmul.bf16 %v2722_v45, %v1451_v46  ;;  %v771_v46 = vld [vmem:[%s4638_s5 + $0x10] sm:$0xff] }
  0x90   : > { %v3606_v57 = vcombine.low %v738_v54, %v738_v54  ;;  %v3608_v58 = vcombine.high %v738_v54, %v738_v54  ;;  %v2754_v59 = vcombine.high %v937_v51, %v938_v52  ;;  %v2753_v60 = vcombine.low %v937_v51, %v938_v52 }
  0x91   : > { %v585_v63 = vpop.permute.xlu0 %584  ;;  %v617_v0 = vpop.permute.xlu1 %616  ;;  %v2802_v2 = vcombine.high %v3598_v53, %v3604_v56  ;;  %v2801_v3 = vcombine.low %v3598_v53, %v3604_v56  ;;  %v1993_v53 = vld [vmem:[%s4640_s7 + $0x58] sm:$0xf]  ;;  %v1994_v56 = vld [vmem:[%s4640_s7 + $0x5c] sm:$0xf] }
  0x92   : > { %v3625_v4 = vsel %vm654_vm0, %v3409_v8, %v585_v63  ;;  %1361 = vmatprep.mubr.bf16.mxu1 %v2754_v59  ;;  %v913_v5 = vmul.bf16 %v3606_v57, %v769_v55  ;;  %v914_v6 = vmul.bf16 %v3608_v58, %v770_v61  ;;  %v796_v8 = vld [vmem:[%s4638_s5 + $0xd8] sm:$0xff]  ;;  %v3262_v55 = vld [vmem:[%s4636_s3 + $0x20] sm:$0xff]   ;;  %v3272_v63 = vld [vmem:[%s4637_s4 + $0x8] sm:$0xff]  }
  0x93   : > { %1362 = vmatmul.mubr.bf16.vlgmr.msra.gmra.mxu1 %v2753_v60  ;;  %v731_v10 = vsel %vm703_vm1, %v3625_v4, %v617_v0 }
  0x94   : > { %3008 = vmatpush3.bf16.msra.mxu1 %v3255_v62  ;;  %v2730_v15 = vcombine.high %v913_v5, %v914_v6  ;;  %v2729_v17 = vcombine.low %v913_v5, %v914_v6  ;;  %v3263_v62 = vld [vmem:[%s4636_s3 + $0x58] sm:$0xff]  }
  0x95   : > { %v649_v13 = vpop.permute.xlu0 %648  ;;  %v561_v16 = vpop.permute.xlu1 %560  ;;  %3009 = vmatprep.subr.bf16.mxu1 %v3256_v1 }
  0x96   : > { %v764_v20 = vsel %vm736_vm2, %v731_v10, %v649_v13  ;;  %1265 = vmatprep.mubr.bf16.mxu0 %v2730_v15  ;;  %v3655_v37 = vsel %vm654_vm0, %v3412_v9, %v561_v16  ;;  %v3261_v9 = vld [vmem:[%s4636_s3 + $0x60] sm:$0xff]   ;;  %v3265_v15 = vld [vmem:[%s4636_s3 + $0x50] sm:$0xff]  }
  0x97   : > { %v2723_v34 = vcombine.low %v764_v20, %v764_v20  ;;  %v2724_v35 = vcombine.high %v764_v20, %v764_v20  ;;  %1266 = vmatmul.mubr.bf16.vlgmr.msra.gmra.mxu0 %v2729_v17  ;;  %v1454_v16 = vld [vmem:[%s4639_s6 + $0xe0] sm:$0xff]  ;;  %v1455_v17 = vld [vmem:[%s4639_s6 + $0xe8] sm:$0xff] }
  0x98   : > { %3010 = vmatpush3.bf16.msra.mxu1 %v3258_v7  ;;  %3140 = vmatpush3.bf16.msra.mxu0 %v3490_v25  ;;  %v3264_v7 = vld [vmem:[%s4636_s3 + $0x18] sm:$0xff]   ;;  %v3273_v20 = vld [vmem:[%s4637_s4] sm:$0xff]  }
  0x99   : > { %v939_v39 = vmul.bf16 %v2723_v34, %v795_v11  ;;  %v940_v40 = vmul.bf16 %v2724_v35, %v796_v8  ;;  %v3660_v41 = vmul.bf16 %v2723_v34, %v1452_v12  ;;  %v3662_v42 = vmul.bf16 %v2724_v35, %v1453_v19  ;;  %v593_v43 = vpop.permute.xlu0 %592  ;;  %v625_v44 = vpop.permute.xlu1 %624  ;;  %3011 = vmatprep.subr.bf16.mxu1 %v3259_v21  ;;  %v797_v11 = vld [vmem:[%s4638_s5 + $0xe0] sm:$0xff]  ;;  %v798_v8 = vld [vmem:[%s4638_s5 + $0xe8] sm:$0xff]  ;;  %v3266_v35 = vld [vmem:[%s4636_s3 + $0x10] sm:$0xff]  }
  0x9a   : > { %v707_v45 = vsel %vm703_vm1, %v3655_v37, %v593_v43  ;;  %3141 = vmatprep.subr.bf16.mxu0 %v3270_v23 }
  0x9b   : > { %v740_v49 = vsel %vm736_vm2, %v707_v45, %v625_v44  ;;  %v2756_v25 = vcombine.high %v939_v39, %v940_v40  ;;  %v2755_v50 = vcombine.low %v939_v39, %v940_v40  ;;  %v2804_v51 = vcombine.high %v3660_v41, %v3662_v42 }
  0x9c   : > { %v3679_v52 = vcombine.low %v740_v49, %v740_v49  ;;  %v3681_v54 = vcombine.high %v740_v49, %v740_v49  ;;  %3012 = vmatpush3.bf16.msra.mxu1 %v3260_v38  ;;  %v2803_v59 = vcombine.low %v3660_v41, %v3662_v42  ;;  %3142 = vmatpush3.bf16.msra.mxu0 %v3270_v23  ;;  %v1998_v41 = vld [vmem:[%s4640_s7 + $0x6c] sm:$0xf] }
  0x9d   : > { %v587_v60 = vpop.permute.xlu0 %586  ;;  %1369 = vmatprep.mubr.bf16.mxu1 %v2756_v25  ;;  %v619_v61 = vpop.permute.xlu1 %618  ;;  %3013 = vmatprep.subr.bf16.mxu1 %v3261_v9 }
  0x9e   : > { %v915_v0 = vmul.bf16 %v3679_v52, %v771_v46  ;;  %v916_v1 = vmul.bf16 %v3681_v54, %v772_v48  ;;  %1370 = vmatmul.mubr.bf16.gmra.mxu1 %v2755_v50  ;;  %v3698_v5 = vsel %vm654_vm0, %v3435_v14, %v587_v60  ;;  %3143 = vmatprep.subr.bf16.mxu0 %v3272_v63  ;;  %v773_v46 = vld [vmem:[%s4638_s5 + $0x20] sm:$0xff]  ;;  %v774_v48 = vld [vmem:[%s4638_s5 + $0x28] sm:$0xff] }
  0x9f   : > { %v733_v10 = vsel %vm703_vm1, %v3698_v5, %v619_v61  ;;  %v2853_v42 = vcombine.low %v3698_v5, %v3698_v5 }
  0xa0   : > { %v2732_v6 = vcombine.high %v915_v0, %v916_v1  ;;  %3014 = vmatpush3.bf16.msra.mxu1 %v3262_v55  ;;  %v2731_v13 = vcombine.low %v915_v0, %v916_v1  ;;  %3144 = vmatpush3.bf16.msra.mxu0 %v3272_v63  ;;  %v3269_v1 = vld [vmem:[%s4636_s3 + $0x40] sm:$0xff]  }
  0xa1   : > { %v651_v14 = vpop.permute.xlu0 %650  ;;  %v563_v12 = vpop.permute.xlu1 %562  ;;  %3015 = vmatprep.subr.bf16.mxu1 %v3263_v62  ;;  %3145 = vmatprep.subr.bf16.mxu0 %v3273_v20  ;;  %v3268_v62 = vld [vmem:[%s4636_s3 + $0x8] sm:$0xff]  }
  0xa2   : > { %v766_v19 = vsel %vm736_vm2, %v733_v10, %v651_v14  ;;  %1273 = vmatprep.mubr.bf16.mxu0 %v2732_v6  ;;  %v3726_v34 = vsel %vm654_vm0, %v3455_v18, %v563_v12  ;;  %v3267_v18 = vld [vmem:[%s4636_s3 + $0x48] sm:$0xff]   ;;  %v3271_v14 = vld [vmem:[%s4636_s3] sm:$0xff]  }
  0xa3   : > { %v2725_v21 = vcombine.low %v766_v19, %v766_v19  ;;  %v2726_v23 = vcombine.high %v766_v19, %v766_v19  ;;  %1274 = vmatmul.mubr.bf16.gmra.mxu0 %v2731_v13  ;;  %v1426_v12 = vld [vmem:[%s4639_s6] sm:$0xff]  ;;  %v1427_v13 = vld [vmem:[%s4639_s6 + $0x8] sm:$0xff] }
  0xa4   : > { %3016 = vmatpush3.bf16.msra.mxu1 %v3264_v7  ;;  %3146 = vmatpush3.bf16.msra.mxu0 %v3273_v20  ;;  %v800_v20 = vld [vmem:[%s4638_s5 + $0xf8] sm:$0xff] }
  0xa5   : > { %v941_v38 = vmul.bf16 %v2725_v21, %v797_v11  ;;  %v942_v39 = vmul.bf16 %v2726_v23, %v798_v8  ;;  %v3731_v40 = vmul.bf16 %v2725_v21, %v1454_v16  ;;  %v3733_v43 = vmul.bf16 %v2726_v23, %v1455_v17  ;;  %v595_v44 = vpop.permute.xlu0 %594  ;;  %v627_v9 = vpop.permute.xlu1 %626  ;;  %3017 = vmatprep.subr.bf16.mxu1 %v3265_v15  ;;  %v1456_v21 = vld [vmem:[%s4639_s6 + $0xf0] sm:$0xff]  ;;  %v1457_v23 = vld [vmem:[%s4639_s6 + $0xf8] sm:$0xff] }
  0xa6   : > { %v709_v45 = vsel %vm703_vm1, %v3726_v34, %v595_v44  ;;  %v1458_v44 = vmul.bf16 %v3606_v57, %v1426_v12  ;;  %v775_v57 = vld [vmem:[%s4638_s5 + $0x30] sm:$0xff] }
  0xa7   : > { %v742_v49 = vsel %vm736_vm2, %v709_v45, %v627_v9  ;;  %v2758_v25 = vcombine.high %v941_v38, %v942_v39  ;;  %v2757_v50 = vcombine.low %v941_v38, %v942_v39  ;;  %v2806_v55 = vcombine.high %v3731_v40, %v3733_v43 }
  0xa8   : > { %v3749_v60 = vcombine.low %v742_v49, %v742_v49  ;;  %v3751_v61 = vcombine.high %v742_v49, %v742_v49  ;;  %3018 = vmatpush3.bf16.msra.mxu1 %v3266_v35  ;;  %v2805_v6 = vcombine.low %v3731_v40, %v3733_v43  ;;  %v1459_v9 = vmul.bf16 %v3608_v58, %v1427_v13  ;;  %v2002_v40 = vld [vmem:[%s4640_s7 + $0x7c] sm:$0xf] }
  0xa9   : > { %v589_v63 = vpop.permute.xlu0 %588  ;;  %1377 = vmatprep.mubr.bf16.mxu1 %v2758_v25  ;;  %v621_v0 = vpop.permute.xlu1 %620  ;;  %3019 = vmatprep.subr.bf16.mxu1 %v3267_v18 }
  0xaa   : > { %v917_v7 = vmul.bf16 %v3749_v60, %v773_v46  ;;  %v918_v10 = vmul.bf16 %v3751_v61, %v774_v48  ;;  %1378 = vmatmul.mubr.bf16.gmra.mxu1 %v2757_v50  ;;  %v3765_v11 = vsel %vm654_vm0, %v3475_v22, %v589_v63  ;;  %v799_v22 = vld [vmem:[%s4638_s5 + $0xf0] sm:$0xff]  ;;  %v2778_v12 = vcombine.high %v1458_v44, %v1459_v9 }
  0xab   : > { %v735_v15 = vsel %vm703_vm1, %v3765_v11, %v621_v0 }
  0xac   : > { %v2734_v8 = vcombine.high %v917_v7, %v918_v10  ;;  %3020 = vmatpush3.bf16.msra.mxu1 %v3268_v62  ;;  %v2733_v19 = vcombine.low %v917_v7, %v918_v10 }
  0xad   : > { %v653_v16 = vpop.permute.xlu0 %652  ;;  %v565_v17 = vpop.permute.xlu1 %564  ;;  %3021 = vmatprep.subr.bf16.mxu1 %v3269_v1 }
  0xae   : > { %v768_v35 = vsel %vm736_vm2, %v735_v15, %v653_v16  ;;  %1281 = vmatprep.mubr.bf16.mxu0 %v2734_v8  ;;  %v3795_v18 = vsel %vm654_vm0, %v3485_v24, %v565_v17  ;;  %v776_v24 = vld [vmem:[%s4638_s5 + $0x38] sm:$0xff]  ;;  %v1428_v15 = vld [vmem:[%s4639_s6 + $0x10] sm:$0xff] }
  0xaf   : > { %v2727_v38 = vcombine.low %v768_v35, %v768_v35  ;;  %v2728_v39 = vcombine.high %v768_v35, %v768_v35  ;;  %1282 = vmatmul.mubr.bf16.gmra.mxu0 %v2733_v19 }
  0xb0   : > { %3022 = vmatpush3.bf16.msra.mxu1 %v3271_v14 }
  0xb1   : > { %v943_v45 = vmul.bf16 %v2727_v38, %v799_v22  ;;  %v944_v46 = vmul.bf16 %v2728_v39, %v800_v20  ;;  %v3797_v48 = vmul.bf16 %v2727_v38, %v1456_v21  ;;  %v3799_v49 = vmul.bf16 %v2728_v39, %v1457_v23  ;;  %v597_v25 = vpop.permute.xlu0 %596  ;;  %v629_v50 = vpop.permute.xlu1 %628  ;;  %v1429_v22 = vld [vmem:[%s4639_s6 + $0x18] sm:$0xff] }
  0xb2   : > { %v711_v62 = vsel %vm703_vm1, %v3795_v18, %v597_v25  ;;  %v1460_v23 = vmul.bf16 %v3679_v52, %v1428_v15  ;;  %v1461_v35 = vmul.bf16 %v3681_v54, %v1429_v22  ;;  %v2777_v54 = vcombine.low %v1458_v44, %v1459_v9  ;;  %v779_v44 = vld [vmem:[%s4638_s5 + $0x50] sm:$0xff]  ;;  %v780_v9 = vld [vmem:[%s4638_s5 + $0x58] sm:$0xff] }
  0xb3   : > { %v744_v58 = vsel %vm736_vm2, %v711_v62, %v629_v50  ;;  %v2760_v63 = vcombine.high %v943_v45, %v944_v46  ;;  %v2759_v0 = vcombine.low %v943_v45, %v944_v46  ;;  %v2808_v1 = vcombine.high %v3797_v48, %v3799_v49  ;;  %v777_v46 = vld [vmem:[%s4638_s5 + $0x40] sm:$0xff] }
  0xb4   : > { %v3812_v7 = vcombine.low %v744_v58, %v744_v58  ;;  %v3814_v10 = vcombine.high %v744_v58, %v744_v58  ;;  %v2807_v8 = vcombine.low %v3797_v48, %v3799_v49 }
  0xb5   : > { %v567_v14 = vpop.permute.xlu0 %566  ;;  %1385 = vmatprep.mubr.bf16.mxu1 %v2760_v63  ;;  %v599_v13 = vpop.permute.xlu1 %598  ;;  %v2780_v63 = vcombine.high %v1460_v23, %v1461_v35 }
  0xb6   : > { %v919_v16 = vmul.bf16 %v3812_v7, %v775_v57  ;;  %v920_v17 = vmul.bf16 %v3814_v10, %v776_v24  ;;  %1386 = vmatmul.mubr.bf16.gmra.mxu1 %v2759_v0  ;;  %v3828_v19 = vsel %vm654_vm0, %v3502_v26, %v567_v14  ;;  %v778_v26 = vld [vmem:[%s4638_s5 + $0x48] sm:$0xff]  ;;  %v1430_v14 = vld [vmem:[%s4639_s6 + $0x20] sm:$0xff] }
  0xb7   : > { %1810 = vmatprep.mubr.bf16.mxu1 %v2778_v12  ;;  %v713_v20 = vsel %vm703_vm1, %v3828_v19, %v599_v13  ;;  %v1431_v12 = vld [vmem:[%s4639_s6 + $0x28] sm:$0xff] }
  0xb8   : > { %v2736_v21 = vcombine.high %v919_v16, %v920_v17  ;;  %v2735_v39 = vcombine.low %v919_v16, %v920_v17  ;;  %v1462_v17 = vmul.bf16 %v3749_v60, %v1430_v14 }
  0xb9   : > { %v631_v38 = vpop.permute.xlu0 %630  ;;  %v569_v45 = vpop.permute.xlu1 %568 }
  0xba   : > { %v746_v25 = vsel %vm736_vm2, %v713_v20, %v631_v38  ;;  %1289 = vmatprep.mubr.bf16.mxu0 %v2736_v21  ;;  %v3847_v52 = vsel %vm654_vm0, %v3509_v27, %v569_v45  ;;  %v1463_v20 = vmul.bf16 %v3751_v61, %v1431_v12  ;;  %v1432_v61 = vld [vmem:[%s4639_s6 + $0x30] sm:$0xff] }
  0xbb   : > { %v3841_v50 = vcombine.low %v746_v25, %v746_v25  ;;  %v3843_v62 = vcombine.high %v746_v25, %v746_v25  ;;  %1290 = vmatmul.mubr.bf16.gmra.mxu0 %v2735_v39  ;;  %v2779_v25 = vcombine.low %v1460_v23, %v1461_v35  ;;  %v782_v23 = vld [vmem:[%s4638_s5 + $0x68] sm:$0xff] }
  0xbd   : > { %v921_v57 = vmul.bf16 %v3841_v50, %v777_v46  ;;  %v922_v24 = vmul.bf16 %v3843_v62, %v778_v26  ;;  %v601_v58 = vpop.permute.xlu0 %600  ;;  %v633_v0 = vpop.permute.xlu1 %632 }
  0xbe   : > { %1811 = vmatmul.mubr.bf16.vlgmr.msra.gmra.mxu1 %v2777_v54  ;;  %v715_v27 = vsel %vm703_vm1, %v3847_v52, %v601_v58 }
  0xbf   : > { %1818 = vmatprep.mubr.bf16.mxu1 %v2780_v63  ;;  %v748_v13 = vsel %vm736_vm2, %v715_v27, %v633_v0  ;;  %v2738_v15 = vcombine.high %v921_v57, %v922_v24  ;;  %v2737_v21 = vcombine.low %v921_v57, %v922_v24  ;;  %v2782_v57 = vcombine.high %v1462_v17, %v1463_v20  ;;  %v1433_v63 = vld [vmem:[%s4639_s6 + $0x38] sm:$0xff] }
  0xc0   : > { %v3866_v22 = vcombine.low %v748_v13, %v748_v13  ;;  %v3868_v16 = vcombine.high %v748_v13, %v748_v13  ;;  %v1464_v27 = vmul.bf16 %v3812_v7, %v1432_v61  ;;  %v784_v7 = vld [vmem:[%s4638_s5 + $0x78] sm:$0xff] }
  0xc1   : > { %1297 = vmatprep.mubr.bf16.mxu0 %v2738_v15  ;;  %v571_v38 = vpop.permute.xlu0 %570  ;;  %v603_v39 = vpop.permute.xlu1 %602 }
  0xc2   : > { %v923_v45 = vmul.bf16 %v3866_v22, %v779_v44  ;;  %v924_v46 = vmul.bf16 %v3868_v16, %v780_v9  ;;  %v3876_v26 = vsel %vm654_vm0, %v3520_v28, %v571_v38  ;;  %v781_v28 = vld [vmem:[%s4638_s5 + $0x60] sm:$0xff]  ;;  %v1465_v44 = vmul.bf16 %v3814_v10, %v1433_v63 }
  0xc3   : > { %1298 = vmatmul.mubr.bf16.gmra.mxu0 %v2737_v21  ;;  %v717_v54 = vsel %vm703_vm1, %v3876_v26, %v603_v39 }
  0xc4   : > { %v2740_v60 = vcombine.high %v923_v45, %v924_v46  ;;  %v2739_v15 = vcombine.low %v923_v45, %v924_v46  ;;  %v2784_v46 = vcombine.high %v1464_v27, %v1465_v44 }
  0xc5   : > { %v635_v24 = vpop.permute.xlu0 %634  ;;  %v573_v58 = vpop.permute.xlu1 %572 }
  0xc6   : > { %1819 = vmatmul.mubr.bf16.gmra.mxu1 %v2779_v25  ;;  %v750_v35 = vsel %vm736_vm2, %v717_v54, %v635_v24  ;;  %1305 = vmatprep.mubr.bf16.mxu0 %v2740_v60  ;;  %v3899_v12 = vsel %vm654_vm0, %v3527_v29, %v573_v58  ;;  %v783_v29 = vld [vmem:[%s4638_s5 + $0x70] sm:$0xff]  ;;  %v2781_v54 = vcombine.low %v1462_v17, %v1463_v20  ;;  %v1434_v24 = vld [vmem:[%s4639_s6 + $0x40] sm:$0xff]  ;;  %v1435_v58 = vld [vmem:[%s4639_s6 + $0x48] sm:$0xff] }
  0xc7   : > { %1826 = vmatprep.mubr.bf16.mxu1 %v2782_v57  ;;  %v3893_v0 = vcombine.low %v750_v35, %v750_v35  ;;  %v3895_v14 = vcombine.high %v750_v35, %v750_v35  ;;  %v1466_v35 = vmul.bf16 %v3841_v50, %v1434_v24  ;;  %v1437_v24 = vld [vmem:[%s4639_s6 + $0x58] sm:$0xff] }
  0xc9   : > { %v925_v9 = vmul.bf16 %v3893_v0, %v781_v28  ;;  %v926_v13 = vmul.bf16 %v3895_v14, %v782_v23  ;;  %v605_v21 = vpop.permute.xlu0 %604  ;;  %v637_v38 = vpop.permute.xlu1 %636 }
  0xca   : > { %v719_v39 = vsel %vm703_vm1, %v3899_v12, %v605_v21 }
  0xcb   : > { %1306 = vmatmul.mubr.bf16.gmra.mxu0 %v2739_v15  ;;  %v2742_v25 = vcombine.high %v925_v9, %v926_v13  ;;  %v752_v10 = vsel %vm736_vm2, %v719_v39, %v637_v38  ;;  %v1467_v15 = vmul.bf16 %v3843_v62, %v1435_v58  ;;  %v2741_v21 = vcombine.low %v925_v9, %v926_v13 }
  0xcc   : > { %v3914_v60 = vcombine.low %v752_v10, %v752_v10  ;;  %v3916_v45 = vcombine.high %v752_v10, %v752_v10  ;;  %v2783_v62 = vcombine.low %v1464_v27, %v1465_v44 }
  0xcd   : > { %1313 = vmatprep.mubr.bf16.mxu0 %v2742_v25  ;;  %v575_v61 = vpop.permute.xlu0 %574  ;;  %v607_v57 = vpop.permute.xlu1 %606  ;;  %v785_v25 = vld [vmem:[%s4638_s5 + $0x80] sm:$0xff]  ;;  %v2786_v9 = vcombine.high %v1466_v35, %v1467_v15 }
  0xce   : > { %1827 = vmatmul.mubr.bf16.gmra.mxu1 %v2781_v54  ;;  %v927_v63 = vmul.bf16 %v3914_v60, %v783_v29  ;;  %v928_v17 = vmul.bf16 %v3916_v45, %v784_v7  ;;  %v3928_v20 = vsel %vm654_vm0, %v3538_v30, %v575_v61  ;;  %v786_v30 = vld [vmem:[%s4638_s5 + $0x88] sm:$0xff] }
  0xcf   : > { %1834 = vmatprep.mubr.bf16.mxu1 %v2784_v46  ;;  %v721_v28 = vsel %vm703_vm1, %v3928_v20, %v607_v57  ;;  %v1436_v57 = vld [vmem:[%s4639_s6 + $0x50] sm:$0xff] }
  0xd0   : > { %v2744_v23 = vcombine.high %v927_v63, %v928_v17 }
  0xd1   : > { %v639_v38 = vpop.permute.xlu0 %638  ;;  %v577_v39 = vpop.permute.xlu1 %576 }
  0xd2   : > { %v754_v29 = vsel %vm736_vm2, %v721_v28, %v639_v38  ;;  %v3947_v50 = vsel %vm654_vm0, %v3545_v31, %v577_v39  ;;  %v2743_v38 = vcombine.low %v927_v63, %v928_v17  ;;  %v787_v39 = vld [vmem:[%s4638_s5 + $0x90] sm:$0xff] }
  0xd3   : > { %1314 = vmatmul.mubr.bf16.gmra.mxu0 %v2741_v21  ;;  %v3941_v7 = vcombine.low %v754_v29, %v754_v29  ;;  %v3943_v10 = vcombine.high %v754_v29, %v754_v29  ;;  %v1469_v21 = vmul.bf16 %v3868_v16, %v1437_v24 }
  0xd4   : > { %1321 = vmatprep.mubr.bf16.mxu0 %v2744_v23  ;;  %v1468_v23 = vmul.bf16 %v3866_v22, %v1436_v57  ;;  %v1438_v57 = vld [vmem:[%s4639_s6 + $0x60] sm:$0xff] }
  0xd5   : > { %v929_v13 = vmul.bf16 %v3941_v7, %v785_v25  ;;  %v930_v54 = vmul.bf16 %v3943_v10, %v786_v30  ;;  %v609_v46 = vpop.permute.xlu0 %608  ;;  %v641_v61 = vpop.permute.xlu1 %640  ;;  %v788_v25 = vld [vmem:[%s4638_s5 + $0x98] sm:$0xff] }
  0xd6   : > { %1835 = vmatmul.mubr.bf16.gmra.mxu1 %v2783_v62  ;;  %v723_v31 = vsel %vm703_vm1, %v3947_v50, %v609_v46  ;;  %v2788_v17 = vcombine.high %v1468_v23, %v1469_v21 }
  0xd7   : > { %1842 = vmatprep.mubr.bf16.mxu1 %v2786_v9  ;;  %v756_v27 = vsel %vm736_vm2, %v723_v31, %v641_v61  ;;  %v2746_v44 = vcombine.high %v929_v13, %v930_v54  ;;  %v2785_v9 = vcombine.low %v1466_v35, %v1467_v15 }
  0xd8   : > { %v3960_v58 = vcombine.low %v756_v27, %v756_v27  ;;  %v3962_v28 = vcombine.high %v756_v27, %v756_v27 }
  0xd9   : > { %v579_v30 = vpop.permute.xlu0 %578  ;;  %v611_v29 = vpop.permute.xlu1 %610 }
  0xda   : > { %v3974_v62 = vsel %vm654_vm0, %v3556_v32, %v579_v30  ;;  %v931_v22 = vmul.bf16 %v3960_v58, %v787_v39  ;;  %v932_v16 = vmul.bf16 %v3962_v28, %v788_v25  ;;  %v1439_v32 = vld [vmem:[%s4639_s6 + $0x68] sm:$0xff]  ;;  %v2745_v39 = vcombine.low %v929_v13, %v930_v54  ;;  %v789_v25 = vld [vmem:[%s4638_s5 + $0xa0] sm:$0xff] }
  0xdb   : > { %1322 = vmatmul.mubr.bf16.gmra.mxu0 %v2743_v38  ;;  %v725_v63 = vsel %vm703_vm1, %v3974_v62, %v611_v29  ;;  %v1471_v38 = vmul.bf16 %v3895_v14, %v1439_v32  ;;  %v790_v30 = vld [vmem:[%s4638_s5 + $0xa8] sm:$0xff] }
  0xdc   : > { %1329 = vmatprep.mubr.bf16.mxu0 %v2746_v44  ;;  %v2748_v27 = vcombine.high %v931_v22, %v932_v16  ;;  %v1470_v44 = vmul.bf16 %v3893_v0, %v1438_v57 }
  0xdd   : > { %v643_v46 = vpop.permute.xlu0 %642  ;;  %v581_v61 = vpop.permute.xlu1 %580 }
  0xde   : > { %1843 = vmatmul.mubr.bf16.gmra.mxu1 %v2785_v9  ;;  %v758_v35 = vsel %vm736_vm2, %v725_v63, %v643_v46  ;;  %v3989_v15 = vsel %vm654_vm0, %v3563_v33, %v581_v61  ;;  %v2787_v63 = vcombine.low %v1468_v23, %v1469_v21  ;;  %v2790_v13 = vcombine.high %v1470_v44, %v1471_v38  ;;  %v1441_v46 = vld [vmem:[%s4639_s6 + $0x78] sm:$0xff] }
  0xdf   : > { %1850 = vmatprep.mubr.bf16.mxu1 %v2788_v17  ;;  %v3991_v24 = vcombine.low %v758_v35, %v758_v35  ;;  %v3993_v31 = vcombine.high %v758_v35, %v758_v35  ;;  %v1440_v17 = vld [vmem:[%s4639_s6 + $0x70] sm:$0xff]  ;;  %v1473_v32 = vmul.bf16 %v3916_v45, %v1441_v46  ;;  %v2747_v35 = vcombine.low %v931_v22, %v932_v16  ;;  %v1443_v45 = vld [vmem:[%s4639_s6 + $0x88] sm:$0xff] }
  0xe0   : > { %v1472_v57 = vmul.bf16 %v3914_v60, %v1440_v17  ;;  %v1442_v60 = vld [vmem:[%s4639_s6 + $0x80] sm:$0xff]  ;;  %v2827_v46 = vcombine.low %v3655_v37, %v3655_v37 }
  0xe1   : > { %v613_v33 = vpop.permute.xlu0 %612  ;;  %v645_v9 = vpop.permute.xlu1 %644  ;;  %v933_v0 = vmul.bf16 %v3991_v24, %v789_v25  ;;  %v934_v14 = vmul.bf16 %v3993_v31, %v790_v30  ;;  %v2789_v25 = vcombine.low %v1470_v44, %v1471_v38  ;;  %v1474_v16 = vmul.bf16 %v3941_v7, %v1442_v60 }
  0xe2   : > { %v727_v29 = vsel %vm703_vm1, %v3989_v15, %v613_v33  ;;  %v1475_v44 = vmul.bf16 %v3943_v10, %v1443_v45  ;;  %v2791_v17 = vcombine.low %v1472_v57, %v1473_v32 }
  0xe3   : > { %1330 = vmatmul.mubr.bf16.gmra.mxu0 %v2745_v39  ;;  %v760_v54 = vsel %vm736_vm2, %v727_v29, %v645_v9  ;;  %v2750_v61 = vcombine.high %v933_v0, %v934_v14  ;;  %v792_v39 = vld [vmem:[%s4638_s5 + $0xb8] sm:$0xff]  ;;  %v2792_v29 = vcombine.high %v1472_v57, %v1473_v32  ;;  %v2749_v38 = vcombine.low %v933_v0, %v934_v14  ;;  %v1444_v14 = vld [vmem:[%s4639_s6 + $0x90] sm:$0xff] }
  0xe4   : > { %1337 = vmatprep.mubr.bf16.mxu0 %v2748_v27  ;;  %v4014_v23 = vcombine.low %v760_v54, %v760_v54  ;;  %v4016_v21 = vcombine.high %v760_v54, %v760_v54  ;;  %v791_v27 = vld [vmem:[%s4638_s5 + $0xb0] sm:$0xff]  ;;  %v2825_v9 = vcombine.low %v3594_v47, %v3594_v47  ;;  %v1972_v54 = vld [vmem:[%s4640_s7 + $0x4] sm:$0xf]  ;;  %v2794_v7 = vcombine.high %v1474_v16, %v1475_v44 }
  0xe5   : > { %v1476_v57 = vmul.bf16 %v3960_v58, %v1444_v14  ;;  %v1975_v58 = vld [vmem:[%s4640_s7 + $0x10] sm:$0xf]  ;;  %v1979_v14 = vld [vmem:[%s4640_s7 + $0x20] sm:$0xf] }
  0xe6   : > { %1851 = vmatmul.mubr.bf16.gmra.mxu1 %v2787_v63  ;;  %v935_v30 = vmul.bf16 %v4014_v23, %v791_v27  ;;  %v936_v33 = vmul.bf16 %v4016_v21, %v792_v39  ;;  %v2826_v63 = vcombine.high %v3594_v47, %v3594_v47  ;;  %v1445_v47 = vld [vmem:[%s4639_s6 + $0x98] sm:$0xff]  ;;  %v1973_v27 = vld [vmem:[%s4640_s7 + $0x8] sm:$0xf]  ;;  %v1974_v39 = vld [vmem:[%s4640_s7 + $0xc] sm:$0xf] }
  0xe7   : > { %1858 = vmatprep.mubr.bf16.mxu1 %v2790_v13  ;;  %v1971_v13 = vld [vmem:[%s4640_s7] sm:$0xf]  ;;  %v1477_v32 = vmul.bf16 %v3962_v28, %v1445_v47  ;;  %v1976_v28 = vld [vmem:[%s4640_s7 + $0x14] sm:$0xf]  ;;  %v1980_v47 = vld [vmem:[%s4640_s7 + $0x24] sm:$0xf] }
  0xe8   : > { %v2752_v22 = vcombine.high %v935_v30, %v936_v33  ;;  %v2115_v10 = vmul.bf16 %v2825_v9, %v1971_v13  ;;  %v2116_v0 = vmul.bf16 %v2826_v63, %v1972_v54  ;;  %v1447_v9 = vld [vmem:[%s4639_s6 + $0xa8] sm:$0xff]  ;;  %v2831_v63 = vcombine.low %v3795_v18, %v3795_v18  ;;  %v1977_v13 = vld [vmem:[%s4640_s7 + $0x18] sm:$0xf]  ;;  %v1978_v54 = vld [vmem:[%s4640_s7 + $0x1c] sm:$0xf] }
  0xe9   : > { %v2796_v45 = vcombine.high %v1476_v57, %v1477_v32 }
  0xeb   : > { %1338 = vmatmul.mubr.bf16.gmra.mxu0 %v2747_v35  ;;  %v2751_v35 = vcombine.low %v935_v30, %v936_v33  ;;  %v2793_v30 = vcombine.low %v1474_v16, %v1475_v44  ;;  %v2117_v33 = vmul.bf16 %v2827_v46, %v1973_v27  ;;  %v2832_v16 = vcombine.high %v3795_v18, %v3795_v18 }
  0xec   : > { %1345 = vmatprep.mubr.bf16.mxu0 %v2750_v61  ;;  %v2828_v61 = vcombine.high %v3655_v37, %v3655_v37  ;;  %v2857_v37 = vcombine.low %v2115_v10, %v2116_v0  ;;  %v2833_v10 = vcombine.low %v3828_v19, %v3828_v19  ;;  %v2834_v0 = vcombine.high %v3828_v19, %v3828_v19  ;;  %v1448_v19 = vld [vmem:[%s4639_s6 + $0xb0] sm:$0xff] }
  0xed   : > { %v2122_v46 = vmul.bf16 %v2832_v16, %v1978_v54  ;;  %v2841_v54 = vcombine.low %v3928_v20, %v3928_v20 }
  0xee   : > { %1859 = vmatmul.mubr.bf16.gmra.mxu1 %v2789_v25  ;;  %v2829_v25 = vcombine.low %v3726_v34, %v3726_v34  ;;  %v2118_v60 = vmul.bf16 %v2828_v61, %v1974_v39  ;;  %v2124_v27 = vmul.bf16 %v2834_v0, %v1980_v47  ;;  %v1449_v39 = vld [vmem:[%s4639_s6 + $0xb8] sm:$0xff] }
  0xef   : > { %1866 = vmatprep.mubr.bf16.mxu1 %v2792_v29  ;;  %v2830_v29 = vcombine.high %v3726_v34, %v3726_v34  ;;  %v1446_v34 = vld [vmem:[%s4639_s6 + $0xa0] sm:$0xff] }
  0xf0   : > { %v2858_v44 = vcombine.low %v2117_v33, %v2118_v60  ;;  %v2838_v33 = vcombine.high %v3876_v26, %v3876_v26 }
  0xf3   : > { %1346 = vmatmul.mubr.bf16.gmra.mxu0 %v2749_v38  ;;  %v2120_v38 = vmul.bf16 %v2830_v29, %v1976_v28  ;;  %v2835_v29 = vcombine.low %v3847_v52, %v3847_v52  ;;  %v1982_v28 = vld [vmem:[%s4640_s7 + $0x2c] sm:$0xf] }
  0xf4   : > { %1353 = vmatprep.mubr.bf16.mxu0 %v2752_v22  ;;  %v2119_v22 = vmul.bf16 %v2829_v25, %v1975_v58  ;;  %v1981_v58 = vld [vmem:[%s4640_s7 + $0x28] sm:$0xf] }
  0xf6   : > { %1867 = vmatmul.mubr.bf16.gmra.mxu1 %v2791_v17  ;;  %v1478_v17 = vmul.bf16 %v3991_v24, %v1446_v34  ;;  %v2859_v18 = vcombine.low %v2119_v22, %v2120_v38  ;;  %v2121_v24 = vmul.bf16 %v2831_v63, %v1977_v13  ;;  %v2840_v63 = vcombine.high %v3899_v12, %v3899_v12  ;;  %v1986_v13 = vld [vmem:[%s4640_s7 + $0x3c] sm:$0xf] }
  0xf7   : > { %1874 = vmatprep.mubr.bf16.mxu1 %v2794_v7  ;;  %v1479_v7 = vmul.bf16 %v3993_v31, %v1447_v9  ;;  %v2795_v31 = vcombine.low %v1476_v57, %v1477_v32  ;;  %v2836_v57 = vcombine.high %v3847_v52, %v3847_v52  ;;  %v1480_v32 = vmul.bf16 %v4014_v23, %v1448_v19  ;;  %v1983_v52 = vld [vmem:[%s4640_s7 + $0x30] sm:$0xf]  ;;  %v1984_v23 = vld [vmem:[%s4640_s7 + $0x34] sm:$0xf] }
  0xf8   : > { %v2860_v25 = vcombine.low %v2121_v24, %v2122_v46  ;;  %v2128_v9 = vmul.bf16 %v2838_v33, %v1984_v23  ;;  %v2844_v46 = vcombine.high %v3947_v50, %v3947_v50  ;;  %v2851_v23 = vcombine.low %v3625_v4, %v3625_v4 }
  0xf9   : > { %v2798_v61 = vcombine.high %v1478_v17, %v1479_v7  ;;  %v2126_v22 = vmul.bf16 %v2836_v57, %v1982_v28  ;;  %v2849_v28 = vcombine.low %v3575_v36, %v3575_v36 }
  0xfb   : > { %1354 = vmatmul.mubr.bf16.gmra.mxu0 %v2751_v35  ;;  %v2123_v35 = vmul.bf16 %v2833_v10, %v1979_v14  ;;  %v1988_v10 = vld [vmem:[%s4640_s7 + $0x44] sm:$0xf]  ;;  %v2130_v14 = vmul.bf16 %v2840_v63, %v1986_v13  ;;  %v2001_v13 = vld [vmem:[%s4640_s7 + $0x78] sm:$0xf] }
  0xfc   : > { %3147 = vmatprep.mubr.msk.bf16.mxu0 %vm703_vm1, %v2857_v37  ;;  %v1481_v37 = vmul.bf16 %v4016_v21, %v1449_v39  ;;  %v2797_v21 = vcombine.low %v1478_v17, %v1479_v7  ;;  %v2842_v17 = vcombine.high %v3928_v20, %v3928_v20  ;;  %v2843_v20 = vcombine.low %v3947_v50, %v3947_v50  ;;  %v1991_v50 = vld [vmem:[%s4640_s7 + $0x50] sm:$0xf]  ;;  %v1992_v39 = vld [vmem:[%s4640_s7 + $0x54] sm:$0xf] }
  0xfd   : > { %v2861_v60 = vcombine.low %v2123_v35, %v2124_v27  ;;  %v1990_v35 = vld [vmem:[%s4640_s7 + $0x4c] sm:$0xf]  ;;  %v2845_v27 = vcombine.low %v3974_v62, %v3974_v62 }
  0xfe   : > { %1875 = vmatmul.mubr.bf16.gmra.mxu1 %v2793_v30  ;;  %v2837_v30 = vcombine.low %v3876_v26, %v3876_v26  ;;  %v2800_v38 = vcombine.high %v1480_v32, %v1481_v37  ;;  %v2839_v26 = vcombine.low %v3899_v12, %v3899_v12  ;;  %v1987_v12 = vld [vmem:[%s4640_s7 + $0x40] sm:$0xf]  ;;  %v2799_v0 = vcombine.low %v1480_v32, %v1481_v37 }
  0xff   : > { %1882 = vmatprep.mubr.bf16.mxu1 %v2796_v45  ;;  %v2125_v45 = vmul.bf16 %v2835_v29, %v1981_v58  ;;  %v2131_v47 = vmul.bf16 %v2841_v54, %v1987_v12  ;;  %v2132_v24 = vmul.bf16 %v2842_v17, %v1988_v10  ;;  %v2134_v29 = vmul.bf16 %v2844_v46, %v1990_v35  ;;  %v470_v17 = vld [vmem:[%s4266_s18 + $0xc0] sm:$0xff]  ;;  %v471_v10 = vld [vmem:[%s4266_s18 + $0xc8] sm:$0xff] }
 0x100   : > { %v2127_v34 = vmul.bf16 %v2837_v30, %v1983_v52  ;;  %v2135_v57 = vmul.bf16 %v2845_v27, %v1991_v50  ;;  %v2848_v37 = vcombine.high %v3989_v15, %v3989_v15  ;;  %v2850_v30 = vcombine.high %v3575_v36, %v3575_v36  ;;  %v447_v46 = vld [vmem:[%s4266_s18 + $0x8] sm:$0xff]  ;;  %v472_v27 = vld [vmem:[%s4266_s18 + $0xd0] sm:$0xff] }
 0x101   : > { %v2862_v16 = vcombine.low %v2125_v45, %v2126_v22  ;;  %v2865_v19 = vcombine.low %v2131_v47, %v2132_v24  ;;  %v1997_v22 = vld [vmem:[%s4640_s7 + $0x68] sm:$0xf] }
 0x102   : > { %v2863_v7 = vcombine.low %v2127_v34, %v2128_v9  ;;  %v2138_v33 = vmul.bf16 %v2848_v37, %v1994_v56  ;;  %v2141_v34 = vmul.bf16 %v2851_v23, %v1997_v22 }
 0x103   : > { %3148 = vmatmul.mubr.msk.bf16.vlgmr.msra.gmra.mxu0 %vm703_vm1, %v2858_v44  ;;  %v1985_v44 = vld [vmem:[%s4640_s7 + $0x38] sm:$0xf] }
 0x104   : > { %3151 = vmatprep.mubr.msk.bf16.mxu0 %vm703_vm1, %v2859_v18  ;;  %v2129_v18 = vmul.bf16 %v2839_v26, %v1985_v44 }
 0x106   : > { %1883 = vmatmul.mubr.bf16.gmra.mxu1 %v2795_v31  ;;  %v2864_v31 = vcombine.low %v2129_v18, %v2130_v14 }
 0x107   : > { %1890 = vmatprep.mubr.bf16.mxu1 %v2798_v61  ;;  %v1989_v61 = vld [vmem:[%s4640_s7 + $0x48] sm:$0xf] }
 0x10b   : > { %3152 = vmatmul.mubr.msk.bf16.gmra.mxu0 %vm703_vm1, %v2860_v25  ;;  %v2133_v25 = vmul.bf16 %v2843_v20, %v1989_v61 }
 0x10c   : > { %3155 = vmatprep.mubr.msk.bf16.mxu0 %vm703_vm1, %v2861_v60 }
 0x10d   : > { %v2866_v58 = vcombine.low %v2133_v25, %v2134_v29 }
 0x10e   : > { %1891 = vmatmul.mubr.bf16.gmra.mxu1 %v2797_v21  ;;  %v2852_v21 = vcombine.high %v3625_v4, %v3625_v4  ;;  %v1999_v4 = vld [vmem:[%s4640_s7 + $0x70] sm:$0xf] }
 0x10f   : > { %1898 = vmatprep.mubr.bf16.mxu1 %v2800_v38  ;;  %v2000_v38 = vld [vmem:[%s4640_s7 + $0x74] sm:$0xf]  ;;  %v2143_v26 = vmul.bf16 %v2853_v42, %v1999_v4  ;;  %v450_v42 = vld [vmem:[%s4266_s18 + $0x20] sm:$0xff] }
 0x110   : > { %v2142_v9 = vmul.bf16 %v2852_v21, %v1998_v41 }
 0x112   : > { %v2870_v44 = vcombine.low %v2141_v34, %v2142_v9  ;;  %v451_v9 = vld [vmem:[%s4266_s18 + $0x28] sm:$0xff] }
 0x113   : > { %3156 = vmatmul.mubr.msk.bf16.gmra.mxu0 %vm703_vm1, %v2862_v16  ;;  %v2856_v16 = vcombine.high %v3765_v11, %v3765_v11 }
 0x114   : > { %3159 = vmatprep.mubr.msk.bf16.mxu0 %vm703_vm1, %v2863_v7 }
 0x116   : > { %1899 = vmatmul.mubr.bf16.gmra.mxu1 %v2799_v0 }
 0x117   : > { %1906 = vmatprep.mubr.bf16.mxu1 %v2802_v2  ;;  %v2846_v2 = vcombine.high %v3974_v62, %v3974_v62  ;;  %v2847_v62 = vcombine.low %v3989_v15, %v3989_v15  ;;  %v1996_v15 = vld [vmem:[%s4640_s7 + $0x64] sm:$0xf] }
 0x118   : > { %v2140_v52 = vmul.bf16 %v2850_v30, %v1996_v15 }
 0x119   : > { %v2136_v32 = vmul.bf16 %v2846_v2, %v1992_v39  ;;  %v2137_v36 = vmul.bf16 %v2847_v62, %v1993_v53  ;;  %v449_v53 = vld [vmem:[%s4266_s18 + $0x18] sm:$0xff] }
 0x11b   : > { %3160 = vmatmul.mubr.msk.bf16.gmra.mxu0 %vm703_vm1, %v2864_v31  ;;  %v2868_v45 = vcombine.low %v2137_v36, %v2138_v33  ;;  %v474_v36 = vld [vmem:[%s4266_s18 + $0xe0] sm:$0xff] }
 0x11c   : > { %3163 = vmatprep.mubr.msk.bf16.mxu0 %vm703_vm1, %v2865_v19 }
 0x11e   : > { %1907 = vmatmul.mubr.bf16.gmra.mxu1 %v2801_v3  ;;  %v2867_v3 = vcombine.low %v2135_v57, %v2136_v32  ;;  %v473_v57 = vld [vmem:[%s4266_s18 + $0xd8] sm:$0xff] }
 0x11f   : > { %1914 = vmatprep.mubr.bf16.mxu1 %v2804_v51  ;;  %v1995_v51 = vld [vmem:[%s4640_s7 + $0x60] sm:$0xf] }
 0x120   : > { %v2139_v60 = vmul.bf16 %v2849_v28, %v1995_v51 }
 0x123   : > { %3164 = vmatmul.mubr.msk.bf16.gmra.mxu0 %vm703_vm1, %v2866_v58 }
 0x124   : > { %3167 = vmatprep.mubr.msk.bf16.mxu0 %vm703_vm1, %v2867_v3 }
 0x126   : > { %1915 = vmatmul.mubr.bf16.gmra.mxu1 %v2803_v59  ;;  %v2854_v59 = vcombine.high %v3698_v5, %v3698_v5  ;;  %v2855_v5 = vcombine.low %v3765_v11, %v3765_v11 }
 0x127   : > { %1922 = vmatprep.mubr.bf16.mxu1 %v2806_v55  ;;  %v2869_v55 = vcombine.low %v2139_v60, %v2140_v52 }
 0x128   : > { %v2144_v63 = vmul.bf16 %v2854_v59, %v2000_v38 }
 0x12a   : > { %v2871_v43 = vcombine.low %v2143_v26, %v2144_v63 }
 0x12b   : > { %3168 = vmatmul.mubr.msk.bf16.gmra.mxu0 %vm703_vm1, %v2868_v45  ;;  %v475_v45 = vld [vmem:[%s4266_s18 + $0xe8] sm:$0xff] }
 0x12c   : > { %3171 = vmatprep.mubr.msk.bf16.mxu0 %vm703_vm1, %v2869_v55 }
 0x12e   : > { %1923 = vmatmul.mubr.bf16.gmra.mxu1 %v2805_v6  ;;  %v2145_v6 = vmul.bf16 %v2855_v5, %v2001_v13 }
 0x12f   : > { %1930 = vmatprep.mubr.bf16.mxu1 %v2808_v1  ;;  %v2146_v1 = vmul.bf16 %v2856_v16, %v2002_v40 }
 0x131   : > { %v2872_v11 = vcombine.low %v2145_v6, %v2146_v1 }
 0x133   : > { %3172 = vmatmul.mubr.msk.bf16.gmra.mxu0 %vm703_vm1, %v2870_v44  ;;  %v476_v44 = vld [vmem:[%s4266_s18 + $0xf0] sm:$0xff] }
 0x134   : > { %3175 = vmatprep.mubr.msk.bf16.mxu0 %vm703_vm1, %v2871_v43 }
 0x136   : > { %1931 = vmatmul.mubr.bf16.gmra.mxu1 %v2807_v8 }
 0x13b   : > { %3176 = vmatmul.mubr.msk.bf16.gmra.mxu0 %vm703_vm1, %v2872_v11  ;;  %v477_v11 = vld [vmem:[%s4266_s18 + $0xf8] sm:$0xff] }
 0x153   : > { %v2983_v54 = vpop.f32.mrf.mxu1 }
 0x155   : > { %v2984_v7 = vpop.f32.mrf.mxu1 }
 0x156   : > { %v2985_v12 = vadd.f32 %v2984_v7, %v2983_v54  ;;  %v452_v7 = vld [vmem:[%s4266_s18 + $0x30] sm:$0xff] }
 0x157   : > { %v2986_v48 = vpop.f32.mrf.mxu1  ;;  %v2911_v8 = vpop.f32.mrf.mxu0 }
 0x158   : > { %v4269_v49 = vadd.f32 %v2985_v12, %v470_v17 }
 0x159   : > { %v2987_v0 = vpop.f32.mrf.mxu1  ;;  %v2912_v18 = vpop.f32.mrf.mxu0 }
 0x15a   : > { %4642 = vst [vmem:[#allocation2_spill] sm:$0xff] %v4269_v49  ;;  %v2988_v14 = vadd.f32 %v2987_v0, %v2986_v48  ;;  %v4272_v47 = vadd.f32 %v2912_v18, %v2911_v8  ;;  %v446_v48 = vld [vmem:[%s4266_s18] sm:$0xff] }
 0x15b   : > { %v2914_v20 = vpop.f32.mrf.mxu0 }
 0x15c   : > { %v4274_v24 = vadd.f32 %v2988_v14, %v471_v10 }
 0x15d   : > { %v2915_v31 = vpop.f32.mrf.mxu0 }
 0x15e   : > { %4643 = vst [vmem:[#allocation3_spill] sm:$0xff] %v4274_v24  ;;  %v2989_v61 = vpop.f32.mrf.mxu1  ;;  %v2916_v35 = vadd.f32 %v2915_v31, %v2914_v20 }
 0x160   : > { %v2990_v2 = vpop.f32.mrf.mxu1  ;;  %v4278_v19 = vadd.f32 %v2916_v35, %v447_v46  ;;  %v1394_v46 = vadd.f32 %v4272_v47, %v446_v48 }
 0x161   : > { %v2991_v50 = vadd.f32 %v2990_v2, %v2989_v61  ;;  %v453_v61 = vld [vmem:[%s4266_s18 + $0x38] sm:$0xff] }
 0x162   : > { %v2992_v39 = vpop.f32.mrf.mxu1 }
 0x163   : > { %v4280_v25 = vadd.f32 %v2991_v50, %v472_v27  ;;  %v2917_v29 = vpop.f32.mrf.mxu0 }
 0x164   : > { %v2993_v32 = vpop.f32.mrf.mxu1 }
 0x165   : > { %4644 = vst [vmem:[#allocation4_spill] sm:$0xff] %v4280_v25  ;;  %v2994_v62 = vadd.f32 %v2993_v32, %v2992_v39  ;;  %v2918_v37 = vpop.f32.mrf.mxu0 }
 0x166   : > { %v4283_v58 = vadd.f32 %v2918_v37, %v2917_v29 }
 0x167   : > { %v4285_v28 = vadd.f32 %v2994_v62, %v473_v57  ;;  %v2920_v30 = vpop.f32.mrf.mxu0  ;;  %v454_v62 = vld [vmem:[%s4266_s18 + $0x40] sm:$0xff] }
 0x169   : > { %4645 = vst [vmem:[#allocation5_spill] sm:$0xff] %v4285_v28  ;;  %v2921_v56 = vpop.f32.mrf.mxu0 }
 0x16a   : > { %v2922_v3 = vadd.f32 %v2921_v56, %v2920_v30  ;;  %v2995_v51 = vpop.f32.mrf.mxu1 }
 0x16c   : > { %v4288_v15 = vadd.f32 %v2922_v3, %v449_v53  ;;  %v2996_v33 = vpop.f32.mrf.mxu1 }
 0x16d   : > { %v2997_v60 = vadd.f32 %v2996_v33, %v2995_v51 }
 0x16e   : > { %v2998_v52 = vpop.f32.mrf.mxu1 }
 0x16f   : > { %v4291_v23 = vadd.f32 %v2997_v60, %v474_v36  ;;  %v2923_v21 = vpop.f32.mrf.mxu0  ;;  %v455_v36 = vld [vmem:[%s4266_s18 + $0x48] sm:$0xff] }
 0x170   : > { %v2999_v22 = vpop.f32.mrf.mxu1 }
 0x171   : > { %4646 = vst [vmem:[#allocation6_spill] sm:$0xff] %v4291_v23  ;;  %v3000_v41 = vadd.f32 %v2999_v22, %v2998_v52  ;;  %v2924_v59 = vpop.f32.mrf.mxu0 }
 0x172   : > { %v2925_v55 = vadd.f32 %v2924_v59, %v2923_v21 }
 0x173   : > { %v4295_v4 = vadd.f32 %v3000_v41, %v475_v45  ;;  %v2926_v38 = vpop.f32.mrf.mxu0  ;;  %v456_v41 = vld [vmem:[%s4266_s18 + $0x50] sm:$0xff] }
 0x174   : > { %v4297_v34 = vadd.f32 %v2925_v55, %v450_v42 }
 0x175   : > { %4647 = vst [vmem:[#allocation7_spill] sm:$0xff] %v4295_v4  ;;  %v2927_v26 = vpop.f32.mrf.mxu0 }
 0x176   : > { %v2928_v63 = vadd.f32 %v2927_v26, %v2926_v38  ;;  %v3001_v5 = vpop.f32.mrf.mxu1  ;;  %v457_v26 = vld [vmem:[%s4266_s18 + $0x58] sm:$0xff] }
 0x178   : > { %v4300_v16 = vadd.f32 %v2928_v63, %v451_v9  ;;  %v3002_v13 = vpop.f32.mrf.mxu1 }
 0x179   : > { %v3003_v40 = vadd.f32 %v3002_v13, %v3001_v5 }
 0x17a   : > { %v3004_v43 = vpop.f32.mrf.mxu1 }
 0x17b   : > { %v4303_v6 = vadd.f32 %v3003_v40, %v476_v44  ;;  %v2929_v1 = vpop.f32.mrf.mxu0 }
 0x17c   : > { %v3005_v54 = vpop.f32.mrf.mxu1 }
 0x17d   : > { %4648 = vst [vmem:[#allocation8_spill] sm:$0xff] %v4303_v6  ;;  %v3006_v17 = vadd.f32 %v3005_v54, %v3004_v43  ;;  %v2930_v12 = vpop.f32.mrf.mxu0  ;;  %v448_v6 = vld [vmem:[%s4266_s18 + $0x10] sm:$0xff] }
 0x17e   : > { %v2931_v8 = vadd.f32 %v2930_v12, %v2929_v1  ;;  %v3023_v10 = vpop.f32.mrf.mxu1  ;;  %v458_v1 = vld [vmem:[%s4266_s18 + $0x60] sm:$0xff] }
 0x17f   : > { %v4308_v0 = vadd.f32 %v3006_v17, %v477_v11  ;;  %v2932_v18 = vpop.f32.mrf.mxu0 }
 0x180   : > { %v4310_v14 = vadd.f32 %v2931_v8, %v452_v7  ;;  %v3024_v20 = vpop.f32.mrf.mxu1  ;;  %v459_v8 = vld [vmem:[%s4266_s18 + $0x68] sm:$0xff] }
 0x181   : > { %4649 = vst [vmem:[#allocation9_spill] sm:$0xff] %v4308_v0  ;;  %v3025_v31 = vadd.f32 %v3024_v20, %v3023_v10  ;;  %v2933_v35 = vpop.f32.mrf.mxu0 }
 0x182   : > { %v2934_v27 = vadd.f32 %v2933_v35, %v2932_v18  ;;  %v3026_v2 = vpop.f32.mrf.mxu1 }
 0x183   : > { %v2935_v50 = vpop.f32.mrf.mxu0  ;;  %v4314_v39 = vadd.f32 %v3025_v31, %v1394_v46 }
 0x184   : > { %v4316_v29 = vadd.f32 %v2934_v27, %v453_v61  ;;  %v3027_v57 = vpop.f32.mrf.mxu1 }
 0x185   : > { %v3028_v32 = vadd.f32 %v3027_v57, %v3026_v2  ;;  %v2936_v37 = vpop.f32.mrf.mxu0 }
 0x186   : > { %v2937_v30 = vadd.f32 %v2936_v37, %v2935_v50  ;;  %v4319_v53 = vpop.f32.mrf.mxu1 }
 0x187   : > { %v2938_v47 = vpop.f32.mrf.mxu0  ;;  %v4322_v56 = vadd.f32 %v3028_v32, %v4278_v19 }
 0x188   : > { %v4324_v3 = vadd.f32 %v2937_v30, %v454_v62  ;;  %v4326_v51 = vpop.f32.mrf.mxu1 }
 0x189   : > { %v2939_v33 = vpop.f32.mrf.mxu0  ;;  %v3031_v28 = vadd.f32 %v4326_v51, %v4319_v53  ;;  %v4461_v51 = vld [vmem:[%s4266_s18 + $0x80] sm:$0xff] }
 0x18a   : > { %v2940_v60 = vadd.f32 %v2939_v33, %v2938_v47  ;;  %v4329_v52 = vpop.f32.mrf.mxu1  ;;  %4662 = vst [vmem:[#allocation22_spill] sm:$0xff] %v4461_v51 }
 0x18b   : > { %v2941_v21 = vpop.f32.mrf.mxu0 }
 0x18c   : > { %v4331_v45 = vadd.f32 %v2940_v60, %v455_v36  ;;  %v4333_v22 = vpop.f32.mrf.mxu1 }
 0x18d   : > { %v2942_v42 = vpop.f32.mrf.mxu0 }
 0x18e   : > { %v2943_v19 = vadd.f32 %v2942_v42, %v2941_v21  ;;  %v4336_v59 = vpop.f32.mrf.mxu1 }
 0x18f   : > { %v2944_v55 = vpop.f32.mrf.mxu0 }
 0x190   : > { %v4338_v38 = vadd.f32 %v2943_v19, %v456_v41  ;;  %v4340_v9 = vpop.f32.mrf.mxu1 }
 0x191   : > { %v2945_v63 = vpop.f32.mrf.mxu0 }
 0x192   : > { %v2946_v5 = vadd.f32 %v2945_v63, %v2944_v55  ;;  %v4343_v44 = vpop.f32.mrf.mxu1 }
 0x193   : > { %v2947_v13 = vpop.f32.mrf.mxu0 }
 0x194   : > { %v4345_v40 = vadd.f32 %v2946_v5, %v457_v26  ;;  %v4347_v43 = vpop.f32.mrf.mxu1 }
 0x195   : > { %v2948_v11 = vpop.f32.mrf.mxu0 }
 0x196   : > { %v2949_v54 = vadd.f32 %v2948_v11, %v2947_v13  ;;  %v4350_v17 = vpop.f32.mrf.mxu1 }
 0x197   : > { %v2950_v7 = vpop.f32.mrf.mxu0 }
 0x198   : > { %v4352_v12 = vadd.f32 %v2949_v54, %v458_v1  ;;  %v4354_v48 = vpop.f32.mrf.mxu1 }
 0x199   : > { %v2951_v10 = vpop.f32.mrf.mxu0 }
 0x19a   : > { %v2952_v18 = vadd.f32 %v2951_v10, %v2950_v7  ;;  %v4357_v20 = vpop.f32.mrf.mxu1 }
 0x19b   : > { %v4359_v46 = vpop.f32.mrf.mxu0 }
 0x19c   : > { %v4361_v31 = vadd.f32 %v2952_v18, %v459_v8  ;;  %v4363_v61 = vpop.f32.mrf.mxu1 }
 0x19d   : > { %v4365_v35 = vpop.f32.mrf.mxu0 }
 0x19e   : > { %4650 = vst [vmem:[#allocation10_spill] sm:$0xff] %v4361_v31  ;;  %v4367_v27 = vpop.f32.mrf.mxu1 }
 0x19f   : > { %v4369_v2 = vpop.f32.mrf.mxu0 }
 0x1a0   : > { %v4371_v50 = vpop.f32.mrf.mxu1 }
 0x1a1   : > { %v4373_v57 = vpop.f32.mrf.mxu0 }
 0x1a2   : > { %v4375_v32 = vpop.f32.mrf.mxu1 }
 0x1a3   : > { %v4377_v62 = vpop.f32.mrf.mxu0 }
 0x1a4   : > { %v4379_v37 = vpop.f32.mrf.mxu1 }
 0x1a5   : > { %v4381_v30 = vpop.f32.mrf.mxu0 }
 0x1a6   : > { %v4383_v47 = vpop.f32.mrf.mxu1 }
 0x1a7   : > { %v4385_v36 = vpop.f32.mrf.mxu0 }
 0x1a8   : > { %4651 = vst [vmem:[#allocation11_spill] sm:$0xff] %v4385_v36  ;;  %v4387_v33 = vpop.f32.mrf.mxu1  ;;  %v4484_v36 = vld [vmem:[%s4266_s18 + $0xb8] sm:$0xff] }
 0x1a9   : > { %v4389_v60 = vpop.f32.mrf.mxu0  ;;  %4668 = vst [vmem:[#allocation28_spill] sm:$0xff] %v4484_v36 }
 0x1aa   : > { %4652 = vst [vmem:[#allocation12_spill] sm:$0xff] %v4389_v60  ;;  %v4391_v21 = vpop.f32.mrf.mxu1  ;;  %v4481_v60 = vld [vmem:[%s4266_s18 + $0xb0] sm:$0xff] }
 0x1ab   : > { %v4393_v41 = vpop.f32.mrf.mxu0  ;;  %4667 = vst [vmem:[#allocation27_spill] sm:$0xff] %v4481_v60 }
 0x1ac   : > { %v4395_v42 = vpop.f32.mrf.mxu1 }
 0x1ad   : > { %v4397_v19 = vpop.f32.mrf.mxu0 }
 0x1ae   : > { %v4399_v55 = vpop.f32.mrf.mxu1 }
 0x1af   : > { %v4401_v26 = vpop.f32.mrf.mxu0 }
 0x1b0   : > { %v4403_v63 = vpop.f32.mrf.mxu1 }
 0x1b1   : > { %v4405_v5 = vpop.f32.mrf.mxu0 }
 0x1b2   : > { %v4407_v13 = vpop.f32.mrf.mxu1 }
 0x1b3   : > { %v4409_v1 = vpop.f32.mrf.mxu0 }
 0x1b4   : > { %4653 = vst [vmem:[#allocation13_spill] sm:$0xff] %v4409_v1  ;;  %v4411_v11 = vpop.f32.mrf.mxu1  ;;  %v3034_v1 = vadd.f32 %v4333_v22, %v4329_v52  ;;  %v4467_v22 = vld [vmem:[%s4266_s18 + $0x90] sm:$0xff] }
 0x1b5   : > { %v4413_v54 = vpop.f32.mrf.mxu0 }
 0x1b6   : > { %4654 = vst [vmem:[#allocation14_spill] sm:$0xff] %v4413_v54  ;;  %v4415_v7 = vpop.f32.mrf.mxu1 }
 0x1b7   : > { %v4417_v8 = vpop.f32.mrf.mxu0 }
 0x1b8   : > { %4655 = vst [vmem:[#allocation15_spill] sm:$0xff] %v4417_v8  ;;  %v4419_v10 = vpop.f32.mrf.mxu1 }
 0x1b9   : > { %v4421_v18 = vpop.f32.mrf.mxu0 }
 0x1ba   : > { %4656 = vst [vmem:[#allocation16_spill] sm:$0xff] %v4421_v18  ;;  %v4423_v4 = vpop.f32.mrf.mxu1  ;;  %v1396_v18 = vadd.f32 %v4283_v58, %v448_v6  ;;  %v4455_v58 = vld [vmem:[%s4266_s18 + $0x70] sm:$0xff]  ;;  %v4458_v6 = vld [vmem:[%s4266_s18 + $0x78] sm:$0xff] }
 0x1bb   : > { %v4425_v0 = vpop.f32.mrf.mxu0 }
 0x1bc   : > { %4657 = vst [vmem:[#allocation17_spill] sm:$0xff] %v4425_v0  ;;  %v4427_v23 = vpop.f32.mrf.mxu1  ;;  %v1941_v53 = vadd.f32 %v3031_v28, %v1396_v18  ;;  %v4470_v28 = vld [vmem:[%s4266_s18 + $0x98] sm:$0xff]  ;;  %v4473_v18 = vld [vmem:[%s4266_s18 + $0xa0] sm:$0xff]  ;;  %v4478_v0 = vld [vmem:[%s4266_s18 + $0xa8] sm:$0xff] }
 0x1bd   : > { %v4430_v24 = vpop.f32.mrf.mxu0  ;;  %4664 = vst [vmem:[#allocation24_spill] sm:$0xff] %v4470_v28  ;;  %4665 = vst [vmem:[#allocation25_spill] sm:$0xff] %v4473_v18 }
 0x1be   : > { %4658 = vst [vmem:[#allocation18_spill] sm:$0xff] %v4430_v24  ;;  %v4434_v49 = vpop.f32.mrf.mxu1  ;;  %4666 = vst [vmem:[#allocation26_spill] sm:$0xff] %v4478_v0  ;;  %v3037_v0 = vadd.f32 %v4340_v9, %v4336_v59  ;;  %v3040_v59 = vadd.f32 %v4347_v43, %v4343_v44  ;;  %v3049_v44 = vadd.f32 %v4371_v50, %v4367_v27 }
 0x1bf   : > { %v4436_v25 = vpop.f32.mrf.mxu0  ;;  %v2955_v27 = vadd.f32 %v4365_v35, %v4359_v46 }
 0x1c0   : > { %4659 = vst [vmem:[#allocation19_spill] sm:$0xff] %v4436_v25  ;;  %v4439_v8 = vpop.f32.mrf.mxu1 }
 0x1c1   : > { %v4441_v54 = vpop.f32.mrf.mxu0  ;;  %v1408_v35 = vadd.f32 %v2955_v27, %v4455_v58 }
 0x1c2   : > { %4660 = vst [vmem:[#allocation20_spill] sm:$0xff] %v4441_v54  ;;  %v4445_v24 = vpop.f32.mrf.mxu1  ;;  %v4464_v54 = vld [vmem:[%s4266_s18 + $0x88] sm:$0xff] }
 0x1c3   : > { %4661 = vst [vmem:[#allocation21_spill] sm:$0xff] %v4445_v24  ;;  %4663 = vst [vmem:[#allocation23_spill] sm:$0xff] %v4464_v54  ;;  %v3149_v52 = vpop.f32.mrf.mxu0  ;;  %v3043_v54 = vadd.f32 %v4354_v48, %v4350_v17 }
 0x1c4   : > { %v2470_v25 = vadd.f32 %v3149_v52, %v1941_v53  ;;  %v4475_v24 = vpop.f32.mrf.mxu1  ;;  %v1942_v53 = vadd.f32 %v3034_v1, %v4288_v15  ;;  %v1943_v1 = vadd.f32 %v3037_v0, %v4297_v34  ;;  %v1944_v34 = vadd.f32 %v3040_v59, %v4300_v16  ;;  %v4675_v27 = vld [vmem:[#allocation24_spill] sm:$0xff] }
 0x1c5   : > { %v2341_v51 = vpop.f32.mrf.mxu0  ;;  %v1945_v15 = vadd.f32 %v3043_v54, %v4310_v14  ;;  %v3070_v59 = vadd.f32 %v4427_v23, %v4423_v4  ;;  %v2961_v4 = vadd.f32 %v4381_v30, %v4377_v62 }
 0x1c6   : > { %2502 = vst [vmem:[%s4452_s23 + $0x10] sm:$0xff] %v2470_v25  ;;  %v2468_v31 = vadd.f32 %v2341_v51, %v4314_v39  ;;  %v4490_v28 = vpop.f32.mrf.mxu1  ;;  %v3046_v25 = vadd.f32 %v4363_v61, %v4357_v20 }
 0x1c7   : > { %v3150_v52 = vpop.f32.mrf.mxu0 }
 0x1c8   : > { %2500 = vst [vmem:[%s4452_s23] sm:$0xff] %v2468_v31  ;;  %v2471_v18 = vadd.f32 %v3150_v52, %v1942_v53  ;;  %v4496_v36 = vpop.f32.mrf.mxu1  ;;  %v1946_v14 = vadd.f32 %v3046_v25, %v4316_v29  ;;  %v3052_v53 = vadd.f32 %v4379_v37, %v4375_v32  ;;  %v3067_v25 = vadd.f32 %v4419_v10, %v4415_v7 }
 0x1c9   : > { %v2344_v60 = vpop.f32.mrf.mxu0  ;;  %v2958_v32 = vadd.f32 %v4373_v57, %v4369_v2  ;;  %v2967_v2 = vadd.f32 %v4397_v19, %v4393_v41 }
 0x1ca   : > { %2503 = vst [vmem:[%s4452_s23 + $0x18] sm:$0xff] %v2471_v18  ;;  %v2469_v39 = vadd.f32 %v2344_v60, %v4322_v56  ;;  %v4502_v17 = vpop.f32.mrf.mxu1  ;;  %v3055_v56 = vadd.f32 %v4387_v33, %v4383_v47  ;;  %v3058_v47 = vadd.f32 %v4395_v42, %v4391_v21  ;;  %v1947_v21 = vadd.f32 %v3049_v44, %v4324_v3 }
 0x1cb   : > { %v3153_v48 = vpop.f32.mrf.mxu0  ;;  %v3061_v3 = vadd.f32 %v4403_v63, %v4399_v55  ;;  %v1948_v7 = vadd.f32 %v3052_v53, %v4331_v45  ;;  %v1409_v55 = vadd.f32 %v2958_v32, %v4458_v6  ;;  %v3064_v63 = vadd.f32 %v4411_v11, %v4407_v13  ;;  %v4676_v53 = vld [vmem:[#allocation21_spill] sm:$0xff] }
 0x1cc   : > { %2501 = vst [vmem:[%s4452_s23 + $0x8] sm:$0xff] %v2469_v39  ;;  %v2474_v9 = vadd.f32 %v3153_v48, %v1945_v15  ;;  %v4508_v31 = vpop.f32.mrf.mxu1  ;;  %v1949_v29 = vadd.f32 %v3055_v56, %v4338_v38  ;;  %v1950_v46 = vadd.f32 %v3058_v47, %v4345_v40  ;;  %v3079_v56 = vadd.f32 %v4496_v36, %v4490_v28  ;;  %v4669_v36 = vld [vmem:[#allocation10_spill] sm:$0xff] }
 0x1cd   : > { %v2357_v20 = vpop.f32.mrf.mxu0  ;;  %v1951_v23 = vadd.f32 %v3061_v3, %v4352_v12  ;;  %v1954_v6 = vadd.f32 %v3070_v59, %v1409_v55  ;;  %v1412_v13 = vadd.f32 %v2967_v2, %v4467_v22  ;;  %v3073_v12 = vadd.f32 %v4439_v8, %v4434_v49  ;;  %v4673_v8 = vld [vmem:[#allocation17_spill] sm:$0xff]  ;;  %v4674_v47 = vld [vmem:[#allocation18_spill] sm:$0xff] }
 0x1ce   : > { %2506 = vst [vmem:[%s4452_s23 + $0x30] sm:$0xff] %v2474_v9  ;;  %v2472_v61 = vadd.f32 %v2357_v20, %v1943_v1  ;;  %v4514_v60 = vpop.f32.mrf.mxu1  ;;  %v1953_v9 = vadd.f32 %v3067_v25, %v1408_v35  ;;  %v1952_v28 = vadd.f32 %v3064_v63, %v4669_v36  ;;  %v3082_v22 = vadd.f32 %v4508_v31, %v4502_v17  ;;  %v4677_v17 = vld [vmem:[#allocation13_spill] sm:$0xff]  ;;  %v4678_v31 = vld [vmem:[#allocation14_spill] sm:$0xff]  ;;  %v4679_v35 = vld [vmem:[#allocation23_spill] sm:$0xff] }
 0x1cf   : > { %v3154_v54 = vpop.f32.mrf.mxu0  ;;  %v1957_v49 = vadd.f32 %v3079_v56, %v1412_v13 }
 0x1d0   : > { %2504 = vst [vmem:[%s4452_s23 + $0x20] sm:$0xff] %v2472_v61  ;;  %v2475_v43 = vadd.f32 %v3154_v54, %v1946_v14  ;;  %v4520_v51 = vpop.f32.mrf.mxu1  ;;  %v2970_v61 = vadd.f32 %v4405_v5, %v4401_v26  ;;  %v4670_v14 = vld [vmem:[#allocation22_spill] sm:$0xff] }
 0x1d1   : > { %v2360_v0 = vpop.f32.mrf.mxu0  ;;  %v1410_v54 = vadd.f32 %v2961_v4, %v4670_v14  ;;  %v4684_v4 = vld [vmem:[#allocation15_spill] sm:$0xff] }
 0x1d2   : > { %2507 = vst [vmem:[%s4452_s23 + $0x38] sm:$0xff] %v2475_v43  ;;  %v2473_v33 = vadd.f32 %v2360_v0, %v1944_v34  ;;  %v4526_v18 = vpop.f32.mrf.mxu1  ;;  %v4671_v43 = vld [vmem:[#allocation11_spill] sm:$0xff]  ;;  %v4672_v34 = vld [vmem:[#allocation12_spill] sm:$0xff] }
 0x1d3   : > { %v3157_v50 = vpop.f32.mrf.mxu0  ;;  %v2964_v0 = vadd.f32 %v4672_v34, %v4671_v43  ;;  %v1955_v25 = vadd.f32 %v3073_v12, %v1410_v54  ;;  %v4686_v12 = vld [vmem:[#allocation28_spill] sm:$0xff]  ;;  %v4687_v54 = vld [vmem:[#allocation26_spill] sm:$0xff] }
 0x1d4   : > { %2505 = vst [vmem:[%s4452_s23 + $0x28] sm:$0xff] %v2473_v33  ;;  %v2478_v16 = vadd.f32 %v3157_v50, %v1949_v29  ;;  %v4534_v52 = vpop.f32.mrf.mxu1  ;;  %v2979_v33 = vadd.f32 %v4674_v47, %v4673_v8  ;;  %v1413_v50 = vadd.f32 %v2970_v61, %v4675_v27 }
 0x1d5   : > { %v2373_v42 = vpop.f32.mrf.mxu0 }
 0x1d6   : > { %2510 = vst [vmem:[%s4452_s23 + $0x50] sm:$0xff] %v2478_v16  ;;  %v2476_v38 = vadd.f32 %v2373_v42, %v1947_v21  ;;  %v3089_v39 = vpop.f32.mrf.mxu1  ;;  %v3076_v16 = vadd.f32 %v4475_v24, %v4676_v53 }
 0x1d7   : > { %v3158_v15 = vpop.f32.mrf.mxu0 }
 0x1d8   : > { %2508 = vst [vmem:[%s4452_s23 + $0x40] sm:$0xff] %v2476_v38  ;;  %v2479_v37 = vadd.f32 %v3158_v15, %v1950_v46  ;;  %v3090_v48 = vpop.f32.mrf.mxu1  ;;  %v2973_v38 = vadd.f32 %v4678_v31, %v4677_v17  ;;  %v1411_v15 = vadd.f32 %v2964_v0, %v4679_v35 }
 0x1d9   : > { %v2376_v10 = vpop.f32.mrf.mxu0  ;;  %v3091_v32 = vadd.f32 %v3090_v48, %v3089_v39  ;;  %v4683_v39 = vld [vmem:[#allocation25_spill] sm:$0xff] }
 0x1da   : > { %2511 = vst [vmem:[%s4452_s23 + $0x58] sm:$0xff] %v2479_v37  ;;  %v2477_v40 = vadd.f32 %v2376_v10, %v1948_v7  ;;  %v3092_v58 = vpop.f32.mrf.mxu1  ;;  %v1958_v7 = vadd.f32 %v3082_v22, %v1413_v50  ;;  %v4680_v10 = vld [vmem:[#allocation27_spill] sm:$0xff]  ;;  %v1414_v48 = vadd.f32 %v2973_v38, %v4683_v39  ;;  %v4690_v38 = vld [vmem:[#allocation5_spill] sm:$0xff] }
 0x1db   : > { %v3161_v57 = vpop.f32.mrf.mxu0  ;;  %v1416_v59 = vadd.f32 %v2979_v33, %v4680_v10 }
 0x1dc   : > { %2509 = vst [vmem:[%s4452_s23 + $0x48] sm:$0xff] %v2477_v40  ;;  %v2482_v45 = vadd.f32 %v3161_v57, %v1953_v9  ;;  %v3093_v1 = vpop.f32.mrf.mxu1  ;;  %v4681_v40 = vld [vmem:[#allocation19_spill] sm:$0xff]  ;;  %v4682_v9 = vld [vmem:[#allocation20_spill] sm:$0xff]  ;;  %v3085_v57 = vadd.f32 %v4520_v51, %v4514_v60  ;;  %v3088_v51 = vadd.f32 %v4534_v52, %v4526_v18 }
 0x1dd   : > { %v2389_v20 = vpop.f32.mrf.mxu0  ;;  %v2982_v2 = vadd.f32 %v4682_v9, %v4681_v40 }
 0x1de   : > { %2514 = vst [vmem:[%s4452_s23 + $0x70] sm:$0xff] %v2482_v45  ;;  %v2480_v41 = vadd.f32 %v2389_v20, %v1951_v23  ;;  %v4563_v19 = vpop.f32.mrf.mxu1  ;;  %v1956_v45 = vadd.f32 %v3076_v16, %v1411_v15  ;;  %v4685_v20 = vld [vmem:[#allocation16_spill] sm:$0xff] }
 0x1df   : > { %v3162_v11 = vpop.f32.mrf.mxu0  ;;  %v2976_v56 = vadd.f32 %v4685_v20, %v4684_v4  ;;  %v1417_v60 = vadd.f32 %v2982_v2, %v4686_v12  ;;  %v4694_v4 = vld [vmem:[#allocation9_spill] sm:$0xff] }
 0x1e0   : > { %2512 = vst [vmem:[%s4452_s23 + $0x60] sm:$0xff] %v2480_v41  ;;  %v2483_v62 = vadd.f32 %v3162_v11, %v1954_v6  ;;  %v3096_v30 = vpop.f32.mrf.mxu1  ;;  %v3094_v41 = vadd.f32 %v3093_v1, %v3092_v58  ;;  %v1961_v11 = vadd.f32 %v3091_v32, %v1416_v59 }
 0x1e1   : > { %v2392_v44 = vpop.f32.mrf.mxu0  ;;  %v3097_v22 = vadd.f32 %v3096_v30, %v4563_v19  ;;  %v4689_v19 = vld [vmem:[#allocation2_spill] sm:$0xff] }
 0x1e2   : > { %2515 = vst [vmem:[%s4452_s23 + $0x78] sm:$0xff] %v2483_v62  ;;  %v2481_v26 = vadd.f32 %v2392_v44, %v1952_v28  ;;  %v3098_v5 = vpop.f32.mrf.mxu1  ;;  %v1959_v28 = vadd.f32 %v3085_v57, %v1414_v48  ;;  %v1415_v44 = vadd.f32 %v2976_v56, %v4687_v54  ;;  %v1962_v34 = vadd.f32 %v3094_v41, %v1417_v60  ;;  %v4695_v41 = vld [vmem:[#allocation7_spill] sm:$0xff] }
 0x1e3   : > { %v3165_v29 = vpop.f32.mrf.mxu0  ;;  %v1963_v30 = vadd.f32 %v3097_v22, %v4689_v19 }
 0x1e4   : > { %2513 = vst [vmem:[%s4452_s23 + $0x68] sm:$0xff] %v2481_v26  ;;  %v2486_v21 = vadd.f32 %v3165_v29, %v1957_v49  ;;  %v3099_v42 = vpop.f32.mrf.mxu1  ;;  %v1960_v52 = vadd.f32 %v3088_v51, %v1415_v44  ;;  %v4688_v29 = vld [vmem:[#allocation4_spill] sm:$0xff] }
 0x1e5   : > { %v2405_v46 = vpop.f32.mrf.mxu0  ;;  %v3100_v53 = vadd.f32 %v3099_v42, %v3098_v5 }
 0x1e6   : > { %2518 = vst [vmem:[%s4452_s23 + $0x90] sm:$0xff] %v2486_v21  ;;  %v2484_v3 = vadd.f32 %v2405_v46, %v1955_v25  ;;  %v3101_v37 = vpop.f32.mrf.mxu1 }
 0x1e7   : > { %v3166_v24 = vpop.f32.mrf.mxu0 }
 0x1e8   : > { %2516 = vst [vmem:[%s4452_s23 + $0x80] sm:$0xff] %v2484_v3  ;;  %v2487_v55 = vadd.f32 %v3166_v24, %v1958_v7  ;;  %v3102_v63 = vpop.f32.mrf.mxu1  ;;  %v4692_v24 = vld [vmem:[#allocation8_spill] sm:$0xff] }
 0x1e9   : > { %v2408_v23 = vpop.f32.mrf.mxu0  ;;  %v3103_v58 = vadd.f32 %v3102_v63, %v3101_v37  ;;  %v4691_v37 = vld [vmem:[#allocation3_spill] sm:$0xff] }
 0x1ea   : > { %2519 = vst [vmem:[%s4452_s23 + $0x98] sm:$0xff] %v2487_v55  ;;  %v2485_v6 = vadd.f32 %v2408_v23, %v1956_v45  ;;  %v3104_v13 = vpop.f32.mrf.mxu1  ;;  %v1964_v5 = vadd.f32 %v3100_v53, %v4691_v37  ;;  %v4693_v55 = vld [vmem:[#allocation6_spill] sm:$0xff] }
 0x1eb   : > { %v3169_v61 = vpop.f32.mrf.mxu0  ;;  %v1965_v27 = vadd.f32 %v3103_v58, %v4688_v29 }
 0x1ec   : > { %2517 = vst [vmem:[%s4452_s23 + $0x88] sm:$0xff] %v2485_v6  ;;  %v2490_v62 = vadd.f32 %v3169_v61, %v1961_v11  ;;  %v3105_v36 = vpop.f32.mrf.mxu1 }
 0x1ed   : > { %v2421_v14 = vpop.f32.mrf.mxu0  ;;  %v3106_v8 = vadd.f32 %v3105_v36, %v3104_v13 }
 0x1ee   : > { %2522 = vst [vmem:[%s4452_s23 + $0xb0] sm:$0xff] %v2490_v62  ;;  %v2488_v1 = vadd.f32 %v2421_v14, %v1959_v28  ;;  %v3107_v43 = vpop.f32.mrf.mxu1 }
 0x1ef   : > { %v3170_v0 = vpop.f32.mrf.mxu0  ;;  %v1966_v46 = vadd.f32 %v3106_v8, %v4690_v38 }
 0x1f0   : > { %2520 = vst [vmem:[%s4452_s23 + $0xa0] sm:$0xff] %v2488_v1  ;;  %v2491_v26 = vadd.f32 %v3170_v0, %v1962_v34  ;;  %v3108_v18 = vpop.f32.mrf.mxu1 }
 0x1f1   : > { %v2424_v49 = vpop.f32.mrf.mxu0  ;;  %v3109_v15 = vadd.f32 %v3108_v18, %v3107_v43 }
 0x1f2   : > { %2523 = vst [vmem:[%s4452_s23 + $0xb8] sm:$0xff] %v2491_v26  ;;  %v2489_v47 = vadd.f32 %v2424_v49, %v1960_v52  ;;  %v3110_v33 = vpop.f32.mrf.mxu1 }
 0x1f3   : > { %v3173_v50 = vpop.f32.mrf.mxu0  ;;  %v1967_v63 = vadd.f32 %v3109_v15, %v4693_v55 }
 0x1f4   : > { %2521 = vst [vmem:[%s4452_s23 + $0xa8] sm:$0xff] %v2489_v47  ;;  %v2494_v16 = vadd.f32 %v3173_v50, %v1965_v27  ;;  %v3111_v21 = vpop.f32.mrf.mxu1 }
 0x1f5   : > { %v2437_v25 = vpop.f32.mrf.mxu0  ;;  %v3112_v2 = vadd.f32 %v3111_v21, %v3110_v33 }
 0x1f6   : > { %2526 = vst [vmem:[%s4452_s23 + $0xd0] sm:$0xff] %v2494_v16  ;;  %v2492_v17 = vadd.f32 %v2437_v25, %v1963_v30  ;;  %v3113_v31 = vpop.f32.mrf.mxu1 }
 0x1f7   : > { %v3174_v35 = vpop.f32.mrf.mxu0  ;;  %v1968_v6 = vadd.f32 %v3112_v2, %v4695_v41 }
 0x1f8   : > { %2524 = vst [vmem:[%s4452_s23 + $0xc0] sm:$0xff] %v2492_v17  ;;  %v2495_v32 = vadd.f32 %v3174_v35, %v1966_v46  ;;  %v3114_v3 = vpop.f32.mrf.mxu1 }
 0x1f9   : > { %v3115_v42 = vadd.f32 %v3114_v3, %v3113_v31  ;;  %v2440_v7 = vpop.f32.mrf.mxu0 }
 0x1fa   : > { %2527 = vst [vmem:[%s4452_s23 + $0xd8] sm:$0xff] %v2495_v32  ;;  %v2493_v10 = vadd.f32 %v2440_v7, %v1964_v5  ;;  %v3116_v59 = vpop.f32.mrf.mxu1 }
 0x1fb   : > { %v1969_v40 = vadd.f32 %v3115_v42, %v4692_v24  ;;  %v3177_v9 = vpop.f32.mrf.mxu0 }
 0x1fc   : > { %2525 = vst [vmem:[%s4452_s23 + $0xc8] sm:$0xff] %v2493_v10  ;;  %v3117_v57 = vpop.f32.mrf.mxu1 }
 0x1fd   : > { %v2498_v45 = vadd.f32 %v3177_v9, %v1969_v40  ;;  %v3118_v39 = vadd.f32 %v3117_v57, %v3116_v59  ;;  %v2453_v48 = vpop.f32.mrf.mxu0 }
 0x1fe   : > { %v2496_v23 = vadd.f32 %v2453_v48, %v1967_v63 }
 0x1ff   : > { %2530 = vst [vmem:[%s4452_s23 + $0xf0] sm:$0xff] %v2498_v45  ;;  %v1970_v20 = vadd.f32 %v3118_v39, %v4694_v4  ;;  %v3178_v56 = vpop.f32.mrf.mxu0 }
 0x200   : > { %2528 = vst [vmem:[%s4452_s23 + $0xe0] sm:$0xff] %v2496_v23 }
 0x201   : > { %v2499_v13 = vadd.f32 %v3178_v56, %v1970_v20  ;;  %v2456_v11 = vpop.f32.mrf.mxu0 }
 0x202   : > { %v2497_v61 = vadd.f32 %v2456_v11, %v1968_v6 }
 0x203   : > { %2531 = vst [vmem:[%s4452_s23 + $0xf8] sm:$0xff] %v2499_v13 }
 0x204   : > { %2529 = vst [vmem:[%s4452_s23 + $0xe8] sm:$0xff] %v2497_v61 }
 0x205 PF: > { %s18_s29 = sadd.s32 1, %s3296_s29   ;;  %s4696_s27 = smov %s3292_s28 }
 0x206   : > { %p15_p5 = scmp.ge.s32.totalorder %s18_s29, 4   ;;  %s4697_s28 = smov %s4699_s30 }
 0x208   :  { %17 = sbr.rel (!%p15_p5) target bundleno = 2 (0x2), region = 94 }

</bundles_post_ra>
